<compile_context>
chip_gen: v7x
topology: tpu7x:2x2x1
jax: 0.10.0
libtpu: 0.0.40
codegen_flags: <defaults>
</compile_context>

<pallas_src>
import jax
import jax.numpy as jnp
from jax.experimental import pallas as pl
from jax.experimental.pallas import tpu as pltpu

INPUT_DIM = 6
H1_DIM = 50
H2_DIM = 50
LATENT_DIM = 2

_round8 = lambda n: ((n + 7) // 8) * 8

# Fused z-weight row layout (each segment padded to a multiple of 8 rows so the
# in-kernel slices start on sublane-tile boundaries — no vreg shifts).
Z_OFF_D1 = 0                               # rows [0, 50)   : d1 pre-activation
Z_OFF_D2 = _round8(H2_DIM)                 # rows [56, 106) : d2 skip term
Z_OFF_DM = Z_OFF_D2 + _round8(H1_DIM)      # rows [112,118) : x_fit skip term
Z_ROWS = Z_OFF_DM + _round8(INPUT_DIM)     # 120

# Stacked output row layout: [mu | log_var | pad | x_fit | pad].
MU_ROW = 0
LOGVAR_ROW = LATENT_DIM                    # 2
XFIT_ROW = _round8(2 * LATENT_DIM)         # 8 (sublane-tile aligned)
OUT_ROWS = XFIT_ROW + _round8(INPUT_DIM)   # 16


def skipvae_kernel(x_ref, eps_ref,
                   we1_ref, be1_ref, we2_ref, be2_ref,
                   wml_ref, bml_ref,
                   wz_ref, bd1_ref,
                   wd2h_ref, bd2_ref,
                   wdmh_ref, bdm_ref,
                   out_ref):
    f32 = jnp.float32
    x = x_ref[...]        # (INPUT_DIM, tb)  -- batch on lanes
    eps = eps_ref[...]    # (LATENT_DIM, tb)

    # ---- encoder ----
    h1 = jnp.maximum(
        jnp.dot(we1_ref[...], x, preferred_element_type=f32) + be1_ref[...], 0.0)
    h2 = jnp.maximum(
        jnp.dot(we2_ref[...], h1, preferred_element_type=f32) + be2_ref[...], 0.0)
    # fused e_mean | e_log_var head: one (2*LATENT, H2) @ (H2, tb) matmul
    ml = jnp.dot(wml_ref[...], h2, preferred_element_type=f32) + bml_ref[...]

    # Store mu|log_var NOW so these vregs are dead through the whole decoder.
    out_ref[MU_ROW:MU_ROW + 2 * LATENT_DIM, :] = ml

    mu = ml[:LATENT_DIM, :]
    log_var = ml[LATENT_DIM:, :]

    # ---- reparameterize (eps supplied from outside the kernel) ----
    z = mu + eps * jnp.exp(0.5 * log_var)

    # ---- decoder with skip connections ----
    # All three K=LATENT matmuls against z fused into a single (Z_ROWS, LATENT)
    # weight; slices below are sublane-aligned (offsets 0 / 56 / 112).
    zz = jnp.dot(wz_ref[...], z, preferred_element_type=f32)        # (Z_ROWS, tb)

    d1 = jnp.maximum(zz[Z_OFF_D1:Z_OFF_D1 + H2_DIM, :] + bd1_ref[...], 0.0)
    # W_d2 @ cat(d1, z)  ==  W_d2h @ d1 + (W_d2z @ z)
    d2 = jnp.maximum(
        jnp.dot(wd2h_ref[...], d1, preferred_element_type=f32)
        + zz[Z_OFF_D2:Z_OFF_D2 + H1_DIM, :] + bd2_ref[...], 0.0)
    # W_dm @ cat(d2, z)  ==  W_dmh @ d2 + (W_dmz @ z)
    x_fit = (jnp.dot(wdmh_ref[...], d2, preferred_element_type=f32)
             + zz[Z_OFF_DM:Z_OFF_DM + INPUT_DIM, :] + bdm_ref[...])

    out_ref[XFIT_ROW:XFIT_ROW + INPUT_DIM, :] = x_fit


def init_linear(key, fan_in, fan_out):
    """torch.nn.Linear-style init; weight in torch (out, in) layout, bias (out,)."""
    bound = 1.0 / jnp.sqrt(float(fan_in))
    kw, kb = jax.random.split(key)
    w = jax.random.uniform(kw, (fan_out, fan_in), jnp.float32, -bound, bound)
    b = jax.random.uniform(kb, (fan_out,), jnp.float32, -bound, bound)
    return w, b


def make_params(key, input_dim, h1_dim, h2_dim, latent_dim, sigmas_init):
    keys = jax.random.split(key, 7)
    p = {}
    p["e1_w"], p["e1_b"] = init_linear(keys[0], input_dim, h1_dim)
    p["e2_w"], p["e2_b"] = init_linear(keys[1], h1_dim, h2_dim)
    p["e_mean_w"], p["e_mean_b"] = init_linear(keys[2], h2_dim, latent_dim)
    p["e_log_var_w"], p["e_log_var_b"] = init_linear(keys[3], h2_dim, latent_dim)
    p["d1_w"], p["d1_b"] = init_linear(keys[4], latent_dim, h2_dim)
    p["d2_w"], p["d2_b"] = init_linear(keys[5], h2_dim + latent_dim, h1_dim)
    p["d_mean_w"], p["d_mean_b"] = init_linear(keys[6], h1_dim + latent_dim, input_dim)
    p["log_sigmas"] = jnp.log(sigmas_init.astype(jnp.float32))
    return p


def _pad_rows(a, rows):
    return jnp.pad(a, ((0, rows - a.shape[0]), (0, 0)))


def _kernel_weights(params):
    """Plumb module-layout params into kernel layout: (out, in) weights, (out, 1)
    biases, fused mu|log_var head, and one fused (Z_ROWS, LATENT) z-weight built
    from d1_w and the skip-concat columns of d2_w / d_mean_w (padded segments)."""
    col = lambda b: b.reshape(-1, 1)
    wml = jnp.concatenate([params["e_mean_w"], params["e_log_var_w"]], axis=0)
    bml = jnp.concatenate([params["e_mean_b"], params["e_log_var_b"]], axis=0)
    wd2 = params["d2_w"]       # (H1, H2 + LATENT)
    wdm = params["d_mean_w"]   # (INPUT, H1 + LATENT)
    wz = jnp.concatenate([
        _pad_rows(params["d1_w"], Z_OFF_D2 - Z_OFF_D1),   # d1 pre-activation
        _pad_rows(wd2[:, H2_DIM:], Z_OFF_DM - Z_OFF_D2),  # d2 skip term
        _pad_rows(wdm[:, H1_DIM:], Z_ROWS - Z_OFF_DM),    # x_fit skip term
    ], axis=0)
    return [
        params["e1_w"], col(params["e1_b"]),
        params["e2_w"], col(params["e2_b"]),
        wml, col(bml),
        wz, col(params["d1_b"]),
        wd2[:, :H2_DIM], col(params["d2_b"]),
        wdm[:, :H1_DIM], col(params["d_mean_b"]),
    ]


def skipvae_forward(params, x, eps, *, tb=256):
    """x: (B, INPUT_DIM), eps: (B, LATENT_DIM) -> (x_fit, mu, log_var, log_sigmas)."""
    assert tb % 128 == 0, "batch tile must be a multiple of 128 (lane-dense layout)"
    B = x.shape[0]
    Bp = pl.cdiv(B, tb) * tb

    # Batch on the lane (last) axis: kernel activations are (features, batch).
    # Callers that can supply (features, batch) f32 directly should skip these.
    xt = x.T
    ept = eps.T
    if Bp != B:
        xt = jnp.pad(xt, ((0, 0), (0, Bp - B)))
        ept = jnp.pad(ept, ((0, 0), (0, Bp - B)))

    weights = _kernel_weights(params)
    batched = lambda feat: pl.BlockSpec((feat, tb), lambda i: (0, i))

    def run(single_buffer_weights):
        if single_buffer_weights:
            # Grid-invariant weights: single-buffer (they are DMA'd exactly once).
            wspec = lambda a: pl.BlockSpec(a.shape, lambda i: (0, 0),
                                           pipeline_mode=pl.Buffered(1))
        else:
            wspec = lambda a: pl.BlockSpec(a.shape, lambda i: (0, 0))
        in_specs = ([batched(INPUT_DIM), batched(LATENT_DIM)]
                    + [wspec(w) for w in weights])
        return pl.pallas_call(
            skipvae_kernel,
            out_shape=jax.ShapeDtypeStruct((OUT_ROWS, Bp), jnp.float32),
            grid_spec=pltpu.PrefetchScalarGridSpec(
                num_scalar_prefetch=0,
                grid=(Bp // tb,),
                in_specs=in_specs,
                out_specs=batched(OUT_ROWS),
            ),
            compiler_params=pltpu.CompilerParams(
                dimension_semantics=("parallel",)),
        )(xt, ept, *weights)

    try:
        out_t = run(True)
    except Exception:
        # TODO(synk): pl.Buffered(1) single-buffering of grid-invariant weights is
        # unsupported on this jax build; fall back to default double-buffering.
        out_t = run(False)

    # One transpose for all three results; slice columns afterwards.
    o = out_t[:, :B].T                                   # (B, OUT_ROWS)
    mu = o[:, MU_ROW:MU_ROW + LATENT_DIM]
    log_var = o[:, LOGVAR_ROW:LOGVAR_ROW + LATENT_DIM]
    x_fit = o[:, XFIT_ROW:XFIT_ROW + INPUT_DIM]
    return x_fit, mu, log_var, params["log_sigmas"]


def skipvae_forward_ref(params, x, eps):
    """Pure-JAX reference matching the PyTorch skipVAE.forward."""
    relu = lambda t: jnp.maximum(t, 0.0)
    lin = lambda t, w, b: t @ w.T + b
    h1 = relu(lin(x, params["e1_w"], params["e1_b"]))
    h2 = relu(lin(h1, params["e2_w"], params["e2_b"]))
    mu = lin(h2, params["e_mean_w"], params["e_mean_b"])
    log_var = lin(h2, params["e_log_var_w"], params["e_log_var_b"])
    z = mu + eps * jnp.exp(0.5 * log_var)
    d1 = relu(lin(z, params["d1_w"], params["d1_b"]))
    d2 = relu(lin(jnp.concatenate([d1, z], axis=1), params["d2_w"], params["d2_b"]))
    x_fit = lin(jnp.concatenate([d2, z], axis=1), params["d_mean_w"], params["d_mean_b"])
    return x_fit, mu, log_var, params["log_sigmas"]


if __name__ == "__main__":
    key = jax.random.PRNGKey(0)
    k_param, k_x, k_eps = jax.random.split(key, 3)

    # grid = B // tb = 4 : >= 2 pipelined steps per TensorCore on v7x (2 TCs),
    # and tb=256 keeps peak vreg liveness well under the 64-vreg file.
    B = 1024
    tb = 256

    sigmas_init = jnp.ones((INPUT_DIM,), jnp.float32)  # sigma_true = 1
    params = make_params(k_param, INPUT_DIM, H1_DIM, H2_DIM, LATENT_DIM, sigmas_init)

    x = jax.random.normal(k_x, (B, INPUT_DIM), jnp.float32)
    # TODO(synk): eps is generated outside the kernel (deterministic) instead of
    # torch.randn_like inside reparameterize; pltpu.prng_* could move it in-kernel.
    eps = jax.random.normal(k_eps, (B, LATENT_DIM), jnp.float32)

    out = skipvae_forward(params, x, eps, tb=tb)
    out = jax.block_until_ready(out)

    ref = skipvae_forward_ref(params, x, eps)
    for a, b in zip(out, ref):
        assert a.shape == b.shape, (a.shape, b.shape)
        assert jnp.allclose(a, b, rtol=1e-4, atol=1e-4), "mismatch vs reference"

    print("KERNEL_OK")
</pallas_src>

<mosaic_0001>
module attributes {stable_mosaic.version = 11 : i64} {
  func.func @skipvae_kernel(%arg0: i32, %arg1: memref<6x256xf32, #tpu.memory_space<vmem>>, %arg2: memref<2x256xf32, #tpu.memory_space<vmem>>, %arg3: memref<50x6xf32, #tpu.memory_space<vmem>>, %arg4: memref<50x1xf32, #tpu.memory_space<vmem>>, %arg5: memref<50x50xf32, #tpu.memory_space<vmem>>, %arg6: memref<50x1xf32, #tpu.memory_space<vmem>>, %arg7: memref<4x50xf32, #tpu.memory_space<vmem>>, %arg8: memref<4x1xf32, #tpu.memory_space<vmem>>, %arg9: memref<120x2xf32, #tpu.memory_space<vmem>>, %arg10: memref<50x1xf32, #tpu.memory_space<vmem>>, %arg11: memref<50x50xf32, #tpu.memory_space<vmem>>, %arg12: memref<50x1xf32, #tpu.memory_space<vmem>>, %arg13: memref<6x50xf32, #tpu.memory_space<vmem>>, %arg14: memref<6x1xf32, #tpu.memory_space<vmem>>, %arg15: memref<16x256xf32, #tpu.memory_space<vmem>>) attributes {dimension_semantics = [#tpu.dimension_semantics<parallel>], iteration_bounds = array<i64: 4>, scalar_prefetch = 0 : i64, scratch_operands = 0 : i64, tpu.core_type = #tpu.core_type<tc>, window_params = [{transform_indices = @transform_0, window_bounds = array<i64: 6, 256>}, {transform_indices = @transform_1, window_bounds = array<i64: 2, 256>}, {pipeline_mode = #tpu.pipeline_mode<synchronous>, transform_indices = @transform_2, window_bounds = array<i64: 50, 6>}, {pipeline_mode = #tpu.pipeline_mode<synchronous>, transform_indices = @transform_3, window_bounds = array<i64: 50, 1>}, {pipeline_mode = #tpu.pipeline_mode<synchronous>, transform_indices = @transform_4, window_bounds = array<i64: 50, 50>}, {pipeline_mode = #tpu.pipeline_mode<synchronous>, transform_indices = @transform_5, window_bounds = array<i64: 50, 1>}, {pipeline_mode = #tpu.pipeline_mode<synchronous>, transform_indices = @transform_6, window_bounds = array<i64: 4, 50>}, {pipeline_mode = #tpu.pipeline_mode<synchronous>, transform_indices = @transform_7, window_bounds = array<i64: 4, 1>}, {pipeline_mode = #tpu.pipeline_mode<synchronous>, transform_indices = @transform_8, window_bounds = array<i64: 120, 2>}, {pipeline_mode = #tpu.pipeline_mode<synchronous>, transform_indices = @transform_9, window_bounds = array<i64: 50, 1>}, {pipeline_mode = #tpu.pipeline_mode<synchronous>, transform_indices = @transform_10, window_bounds = array<i64: 50, 50>}, {pipeline_mode = #tpu.pipeline_mode<synchronous>, transform_indices = @transform_11, window_bounds = array<i64: 50, 1>}, {pipeline_mode = #tpu.pipeline_mode<synchronous>, transform_indices = @transform_12, window_bounds = array<i64: 6, 50>}, {pipeline_mode = #tpu.pipeline_mode<synchronous>, transform_indices = @transform_13, window_bounds = array<i64: 6, 1>}, {transform_indices = @transform_14, window_bounds = array<i64: 16, 256>}]} {
    %c0 = arith.constant 0 : index
    %c0_0 = arith.constant 0 : index
    %0 = vector.load %arg1[%c0, %c0_0] : memref<6x256xf32, #tpu.memory_space<vmem>>, vector<6x256xf32>
    %c0_1 = arith.constant 0 : index
    %c0_2 = arith.constant 0 : index
    %1 = vector.load %arg2[%c0_1, %c0_2] : memref<2x256xf32, #tpu.memory_space<vmem>>, vector<2x256xf32>
    %c0_3 = arith.constant 0 : index
    %c0_4 = arith.constant 0 : index
    %2 = vector.load %arg3[%c0_3, %c0_4] : memref<50x6xf32, #tpu.memory_space<vmem>>, vector<50x6xf32>
    %cst = arith.constant dense<0.000000e+00> : vector<50x256xf32>
    %3 = tpu.matmul %2, %0, %cst {dimension_numbers = #tpu.dot_dimension_numbers<[1], [0], [0], [1], [0, 0, 1, 1], [], []>} : vector<50x6xf32>, vector<6x256xf32>, vector<50x256xf32> -> vector<50x256xf32>
    %c0_5 = arith.constant 0 : index
    %c0_6 = arith.constant 0 : index
    %4 = vector.load %arg4[%c0_5, %c0_6] : memref<50x1xf32, #tpu.memory_space<vmem>>, vector<50x1xf32>
    %5 = vector.broadcast %4 : vector<50x1xf32> to vector<50x256xf32>
    %6 = arith.addf %3, %5 : vector<50x256xf32>
    %cst_7 = arith.constant 0.000000e+00 : f32
    %7 = vector.broadcast %cst_7 : f32 to vector<50x256xf32>
    %8 = arith.maximumf %6, %7 : vector<50x256xf32>
    %c0_8 = arith.constant 0 : index
    %c0_9 = arith.constant 0 : index
    %9 = vector.load %arg5[%c0_8, %c0_9] : memref<50x50xf32, #tpu.memory_space<vmem>>, vector<50x50xf32>
    %cst_10 = arith.constant dense<0.000000e+00> : vector<50x256xf32>
    %10 = tpu.matmul %9, %8, %cst_10 {dimension_numbers = #tpu.dot_dimension_numbers<[1], [0], [0], [1], [0, 0, 1, 1], [], []>} : vector<50x50xf32>, vector<50x256xf32>, vector<50x256xf32> -> vector<50x256xf32>
    %c0_11 = arith.constant 0 : index
    %c0_12 = arith.constant 0 : index
    %11 = vector.load %arg6[%c0_11, %c0_12] : memref<50x1xf32, #tpu.memory_space<vmem>>, vector<50x1xf32>
    %12 = vector.broadcast %11 : vector<50x1xf32> to vector<50x256xf32>
    %13 = arith.addf %10, %12 : vector<50x256xf32>
    %cst_13 = arith.constant 0.000000e+00 : f32
    %14 = vector.broadcast %cst_13 : f32 to vector<50x256xf32>
    %15 = arith.maximumf %13, %14 : vector<50x256xf32>
    %c0_14 = arith.constant 0 : index
    %c0_15 = arith.constant 0 : index
    %16 = vector.load %arg7[%c0_14, %c0_15] : memref<4x50xf32, #tpu.memory_space<vmem>>, vector<4x50xf32>
    %cst_16 = arith.constant dense<0.000000e+00> : vector<4x256xf32>
    %17 = tpu.matmul %16, %15, %cst_16 {dimension_numbers = #tpu.dot_dimension_numbers<[1], [0], [0], [1], [0, 0, 1, 1], [], []>} : vector<4x50xf32>, vector<50x256xf32>, vector<4x256xf32> -> vector<4x256xf32>
    %c0_17 = arith.constant 0 : index
    %c0_18 = arith.constant 0 : index
    %18 = vector.load %arg8[%c0_17, %c0_18] : memref<4x1xf32, #tpu.memory_space<vmem>>, vector<4x1xf32>
    %19 = vector.broadcast %18 : vector<4x1xf32> to vector<4x256xf32>
    %20 = arith.addf %17, %19 : vector<4x256xf32>
    %c0_19 = arith.constant 0 : index
    %c0_20 = arith.constant 0 : index
    %21 = vector.load %arg15[%c0_19, %c0_20] : memref<16x256xf32, #tpu.memory_space<vmem>>, vector<4x256xf32>
    tpu.vector_store %arg15[%c0_19, %c0_20], %20 {strides = array<i32>} : memref<16x256xf32, #tpu.memory_space<vmem>>, vector<4x256xf32>,
    %22 = vector.extract_strided_slice %20 {offsets = [0, 0], sizes = [2, 256], strides = [1, 1]} : vector<4x256xf32> to vector<2x256xf32>
    %23 = vector.extract_strided_slice %20 {offsets = [2, 0], sizes = [2, 256], strides = [1, 1]} : vector<4x256xf32> to vector<2x256xf32>
    %cst_21 = arith.constant 5.000000e-01 : f32
    %24 = vector.broadcast %cst_21 : f32 to vector<2x256xf32>
    %25 = arith.mulf %24, %23 : vector<2x256xf32>
    %26 = math.exp %25 : vector<2x256xf32>
    %27 = arith.mulf %1, %26 : vector<2x256xf32>
    %28 = arith.addf %22, %27 : vector<2x256xf32>
    %c0_22 = arith.constant 0 : index
    %c0_23 = arith.constant 0 : index
    %29 = vector.load %arg9[%c0_22, %c0_23] : memref<120x2xf32, #tpu.memory_space<vmem>>, vector<120x2xf32>
    %cst_24 = arith.constant dense<0.000000e+00> : vector<120x256xf32>
    %30 = tpu.matmul %29, %28, %cst_24 {dimension_numbers = #tpu.dot_dimension_numbers<[1], [0], [0], [1], [0, 0, 1, 1], [], []>} : vector<120x2xf32>, vector<2x256xf32>, vector<120x256xf32> -> vector<120x256xf32>
    %31 = vector.extract_strided_slice %30 {offsets = [0, 0], sizes = [50, 256], strides = [1, 1]} : vector<120x256xf32> to vector<50x256xf32>
    %c0_25 = arith.constant 0 : index
    %c0_26 = arith.constant 0 : index
    %32 = vector.load %arg10[%c0_25, %c0_26] : memref<50x1xf32, #tpu.memory_space<vmem>>, vector<50x1xf32>
    %33 = vector.broadcast %32 : vector<50x1xf32> to vector<50x256xf32>
    %34 = arith.addf %31, %33 : vector<50x256xf32>
    %cst_27 = arith.constant 0.000000e+00 : f32
    %35 = vector.broadcast %cst_27 : f32 to vector<50x256xf32>
    %36 = arith.maximumf %34, %35 : vector<50x256xf32>
    %c0_28 = arith.constant 0 : index
    %c0_29 = arith.constant 0 : index
    %37 = vector.load %arg11[%c0_28, %c0_29] : memref<50x50xf32, #tpu.memory_space<vmem>>, vector<50x50xf32>
    %cst_30 = arith.constant dense<0.000000e+00> : vector<50x256xf32>
    %38 = tpu.matmul %37, %36, %cst_30 {dimension_numbers = #tpu.dot_dimension_numbers<[1], [0], [0], [1], [0, 0, 1, 1], [], []>} : vector<50x50xf32>, vector<50x256xf32>, vector<50x256xf32> -> vector<50x256xf32>
    %39 = vector.extract_strided_slice %30 {offsets = [56, 0], sizes = [50, 256], strides = [1, 1]} : vector<120x256xf32> to vector<50x256xf32>
    %40 = arith.addf %38, %39 : vector<50x256xf32>
    %c0_31 = arith.constant 0 : index
    %c0_32 = arith.constant 0 : index
    %41 = vector.load %arg12[%c0_31, %c0_32] : memref<50x1xf32, #tpu.memory_space<vmem>>, vector<50x1xf32>
    %42 = vector.broadcast %41 : vector<50x1xf32> to vector<50x256xf32>
    %43 = arith.addf %40, %42 : vector<50x256xf32>
    %cst_33 = arith.constant 0.000000e+00 : f32
    %44 = vector.broadcast %cst_33 : f32 to vector<50x256xf32>
    %45 = arith.maximumf %43, %44 : vector<50x256xf32>
    %c0_34 = arith.constant 0 : index
    %c0_35 = arith.constant 0 : index
    %46 = vector.load %arg13[%c0_34, %c0_35] : memref<6x50xf32, #tpu.memory_space<vmem>>, vector<6x50xf32>
    %cst_36 = arith.constant dense<0.000000e+00> : vector<6x256xf32>
    %47 = tpu.matmul %46, %45, %cst_36 {dimension_numbers = #tpu.dot_dimension_numbers<[1], [0], [0], [1], [0, 0, 1, 1], [], []>} : vector<6x50xf32>, vector<50x256xf32>, vector<6x256xf32> -> vector<6x256xf32>
    %48 = vector.extract_strided_slice %30 {offsets = [112, 0], sizes = [6, 256], strides = [1, 1]} : vector<120x256xf32> to vector<6x256xf32>
    %49 = arith.addf %47, %48 : vector<6x256xf32>
    %c0_37 = arith.constant 0 : index
    %c0_38 = arith.constant 0 : index
    %50 = vector.load %arg14[%c0_37, %c0_38] : memref<6x1xf32, #tpu.memory_space<vmem>>, vector<6x1xf32>
    %51 = vector.broadcast %50 : vector<6x1xf32> to vector<6x256xf32>
    %52 = arith.addf %49, %51 : vector<6x256xf32>
    %c8 = arith.constant 8 : index
    %c0_39 = arith.constant 0 : index
    %53 = vector.load %arg15[%c8, %c0_39] : memref<16x256xf32, #tpu.memory_space<vmem>>, vector<6x256xf32>
    tpu.vector_store %arg15[%c8, %c0_39], %52 {strides = array<i32>} : memref<16x256xf32, #tpu.memory_space<vmem>>, vector<6x256xf32>,
    return
  }
  func.func @transform_0(%arg0: i32) -> (i32, i32) {
    %c0_i32 = arith.constant 0 : i32
    %c0_i32_0 = arith.constant 0 : i32
    return %c0_i32, %arg0 : i32, i32
  }
  func.func @transform_1(%arg0: i32) -> (i32, i32) {
    %c0_i32 = arith.constant 0 : i32
    %c0_i32_0 = arith.constant 0 : i32
    return %c0_i32, %arg0 : i32, i32
  }
  func.func @transform_2(%arg0: i32) -> (i32, i32) {
    %c0_i32 = arith.constant 0 : i32
    %c0_i32_0 = arith.constant 0 : i32
    %c0_i32_1 = arith.constant 0 : i32
    return %c0_i32, %c0_i32_0 : i32, i32
  }
  func.func @transform_3(%arg0: i32) -> (i32, i32) {
    %c0_i32 = arith.constant 0 : i32
    %c0_i32_0 = arith.constant 0 : i32
    %c0_i32_1 = arith.constant 0 : i32
    return %c0_i32, %c0_i32_0 : i32, i32
  }
  func.func @transform_4(%arg0: i32) -> (i32, i32) {
    %c0_i32 = arith.constant 0 : i32
    %c0_i32_0 = arith.constant 0 : i32
    %c0_i32_1 = arith.constant 0 : i32
    return %c0_i32, %c0_i32_0 : i32, i32
  }
  func.func @transform_5(%arg0: i32) -> (i32, i32) {
    %c0_i32 = arith.constant 0 : i32
    %c0_i32_0 = arith.constant 0 : i32
    %c0_i32_1 = arith.constant 0 : i32
    return %c0_i32, %c0_i32_0 : i32, i32
  }
  func.func @transform_6(%arg0: i32) -> (i32, i32) {
    %c0_i32 = arith.constant 0 : i32
    %c0_i32_0 = arith.constant 0 : i32
    %c0_i32_1 = arith.constant 0 : i32
    return %c0_i32, %c0_i32_0 : i32, i32
  }
  func.func @transform_7(%arg0: i32) -> (i32, i32) {
    %c0_i32 = arith.constant 0 : i32
    %c0_i32_0 = arith.constant 0 : i32
    %c0_i32_1 = arith.constant 0 : i32
    return %c0_i32, %c0_i32_0 : i32, i32
  }
  func.func @transform_8(%arg0: i32) -> (i32, i32) {
    %c0_i32 = arith.constant 0 : i32
    %c0_i32_0 = arith.constant 0 : i32
    %c0_i32_1 = arith.constant 0 : i32
    return %c0_i32, %c0_i32_0 : i32, i32
  }
  func.func @transform_9(%arg0: i32) -> (i32, i32) {
    %c0_i32 = arith.constant 0 : i32
    %c0_i32_0 = arith.constant 0 : i32
    %c0_i32_1 = arith.constant 0 : i32
    return %c0_i32, %c0_i32_0 : i32, i32
  }
  func.func @transform_10(%arg0: i32) -> (i32, i32) {
    %c0_i32 = arith.constant 0 : i32
    %c0_i32_0 = arith.constant 0 : i32
    %c0_i32_1 = arith.constant 0 : i32
    return %c0_i32, %c0_i32_0 : i32, i32
  }
  func.func @transform_11(%arg0: i32) -> (i32, i32) {
    %c0_i32 = arith.constant 0 : i32
    %c0_i32_0 = arith.constant 0 : i32
    %c0_i32_1 = arith.constant 0 : i32
    return %c0_i32, %c0_i32_0 : i32, i32
  }
  func.func @transform_12(%arg0: i32) -> (i32, i32) {
    %c0_i32 = arith.constant 0 : i32
    %c0_i32_0 = arith.constant 0 : i32
    %c0_i32_1 = arith.constant 0 : i32
    return %c0_i32, %c0_i32_0 : i32, i32
  }
  func.func @transform_13(%arg0: i32) -> (i32, i32) {
    %c0_i32 = arith.constant 0 : i32
    %c0_i32_0 = arith.constant 0 : i32
    %c0_i32_1 = arith.constant 0 : i32
    return %c0_i32, %c0_i32_0 : i32, i32
  }
  func.func @transform_14(%arg0: i32) -> (i32, i32) {
    %c0_i32 = arith.constant 0 : i32
    %c0_i32_0 = arith.constant 0 : i32
    return %c0_i32, %arg0 : i32, i32
  }
}

module attributes {stable_mosaic.version = 11 : i64} {
  func.func @skipvae_kernel(%arg0: i32, %arg1: memref<6x256xf32, #tpu.memory_space<vmem>>, %arg2: memref<2x256xf32, #tpu.memory_space<vmem>>, %arg3: memref<50x6xf32, #tpu.memory_space<vmem>>, %arg4: memref<50x1xf32, #tpu.memory_space<vmem>>, %arg5: memref<50x50xf32, #tpu.memory_space<vmem>>, %arg6: memref<50x1xf32, #tpu.memory_space<vmem>>, %arg7: memref<4x50xf32, #tpu.memory_space<vmem>>, %arg8: memref<4x1xf32, #tpu.memory_space<vmem>>, %arg9: memref<120x2xf32, #tpu.memory_space<vmem>>, %arg10: memref<50x1xf32, #tpu.memory_space<vmem>>, %arg11: memref<50x50xf32, #tpu.memory_space<vmem>>, %arg12: memref<50x1xf32, #tpu.memory_space<vmem>>, %arg13: memref<6x50xf32, #tpu.memory_space<vmem>>, %arg14: memref<6x1xf32, #tpu.memory_space<vmem>>, %arg15: memref<16x256xf32, #tpu.memory_space<vmem>>) attributes {dimension_semantics = [#tpu.dimension_semantics<parallel>], iteration_bounds = array<i64: 4>, scalar_prefetch = 0 : i64, scratch_operands = 0 : i64, tpu.core_type = #tpu.core_type<tc>, window_params = [{transform_indices = @transform_0, window_bounds = array<i64: 6, 256>}, {transform_indices = @transform_1, window_bounds = array<i64: 2, 256>}, {pipeline_mode = #tpu.pipeline_mode<synchronous>, transform_indices = @transform_2, window_bounds = array<i64: 50, 6>}, {pipeline_mode = #tpu.pipeline_mode<synchronous>, transform_indices = @transform_3, window_bounds = array<i64: 50, 1>}, {pipeline_mode = #tpu.pipeline_mode<synchronous>, transform_indices = @transform_4, window_bounds = array<i64: 50, 50>}, {pipeline_mode = #tpu.pipeline_mode<synchronous>, transform_indices = @transform_5, window_bounds = array<i64: 50, 1>}, {pipeline_mode = #tpu.pipeline_mode<synchronous>, transform_indices = @transform_6, window_bounds = array<i64: 4, 50>}, {pipeline_mode = #tpu.pipeline_mode<synchronous>, transform_indices = @transform_7, window_bounds = array<i64: 4, 1>}, {pipeline_mode = #tpu.pipeline_mode<synchronous>, transform_indices = @transform_8, window_bounds = array<i64: 120, 2>}, {pipeline_mode = #tpu.pipeline_mode<synchronous>, transform_indices = @transform_9, window_bounds = array<i64: 50, 1>}, {pipeline_mode = #tpu.pipeline_mode<synchronous>, transform_indices = @transform_10, window_bounds = array<i64: 50, 50>}, {pipeline_mode = #tpu.pipeline_mode<synchronous>, transform_indices = @transform_11, window_bounds = array<i64: 50, 1>}, {pipeline_mode = #tpu.pipeline_mode<synchronous>, transform_indices = @transform_12, window_bounds = array<i64: 6, 50>}, {pipeline_mode = #tpu.pipeline_mode<synchronous>, transform_indices = @transform_13, window_bounds = array<i64: 6, 1>}, {transform_indices = @transform_14, window_bounds = array<i64: 16, 256>}]} {
    %c0 = arith.constant 0 : index
    %c0_0 = arith.constant 0 : index
    %0 = vector.load %arg1[%c0, %c0_0] : memref<6x256xf32, #tpu.memory_space<vmem>>, vector<6x256xf32>
    %c0_1 = arith.constant 0 : index
    %c0_2 = arith.constant 0 : index
    %1 = vector.load %arg2[%c0_1, %c0_2] : memref<2x256xf32, #tpu.memory_space<vmem>>, vector<2x256xf32>
    %c0_3 = arith.constant 0 : index
    %c0_4 = arith.constant 0 : index
    %2 = vector.load %arg3[%c0_3, %c0_4] : memref<50x6xf32, #tpu.memory_space<vmem>>, vector<50x6xf32>
    %cst = arith.constant dense<0.000000e+00> : vector<50x256xf32>
    %3 = tpu.matmul %2, %0, %cst {dimension_numbers = #tpu.dot_dimension_numbers<[1], [0], [0], [1], [0, 0, 1, 1], [], []>} : vector<50x6xf32>, vector<6x256xf32>, vector<50x256xf32> -> vector<50x256xf32>
    %c0_5 = arith.constant 0 : index
    %c0_6 = arith.constant 0 : index
    %4 = vector.load %arg4[%c0_5, %c0_6] : memref<50x1xf32, #tpu.memory_space<vmem>>, vector<50x1xf32>
    %5 = vector.broadcast %4 : vector<50x1xf32> to vector<50x256xf32>
    %6 = arith.addf %3, %5 : vector<50x256xf32>
    %cst_7 = arith.constant 0.000000e+00 : f32
    %7 = vector.broadcast %cst_7 : f32 to vector<50x256xf32>
    %8 = arith.maximumf %6, %7 : vector<50x256xf32>
    %c0_8 = arith.constant 0 : index
    %c0_9 = arith.constant 0 : index
    %9 = vector.load %arg5[%c0_8, %c0_9] : memref<50x50xf32, #tpu.memory_space<vmem>>, vector<50x50xf32>
    %cst_10 = arith.constant dense<0.000000e+00> : vector<50x256xf32>
    %10 = tpu.matmul %9, %8, %cst_10 {dimension_numbers = #tpu.dot_dimension_numbers<[1], [0], [0], [1], [0, 0, 1, 1], [], []>} : vector<50x50xf32>, vector<50x256xf32>, vector<50x256xf32> -> vector<50x256xf32>
    %c0_11 = arith.constant 0 : index
    %c0_12 = arith.constant 0 : index
    %11 = vector.load %arg6[%c0_11, %c0_12] : memref<50x1xf32, #tpu.memory_space<vmem>>, vector<50x1xf32>
    %12 = vector.broadcast %11 : vector<50x1xf32> to vector<50x256xf32>
    %13 = arith.addf %10, %12 : vector<50x256xf32>
    %cst_13 = arith.constant 0.000000e+00 : f32
    %14 = vector.broadcast %cst_13 : f32 to vector<50x256xf32>
    %15 = arith.maximumf %13, %14 : vector<50x256xf32>
    %c0_14 = arith.constant 0 : index
    %c0_15 = arith.constant 0 : index
    %16 = vector.load %arg7[%c0_14, %c0_15] : memref<4x50xf32, #tpu.memory_space<vmem>>, vector<4x50xf32>
    %cst_16 = arith.constant dense<0.000000e+00> : vector<4x256xf32>
    %17 = tpu.matmul %16, %15, %cst_16 {dimension_numbers = #tpu.dot_dimension_numbers<[1], [0], [0], [1], [0, 0, 1, 1], [], []>} : vector<4x50xf32>, vector<50x256xf32>, vector<4x256xf32> -> vector<4x256xf32>
    %c0_17 = arith.constant 0 : index
    %c0_18 = arith.constant 0 : index
    %18 = vector.load %arg8[%c0_17, %c0_18] : memref<4x1xf32, #tpu.memory_space<vmem>>, vector<4x1xf32>
    %19 = vector.broadcast %18 : vector<4x1xf32> to vector<4x256xf32>
    %20 = arith.addf %17, %19 : vector<4x256xf32>
    %c0_19 = arith.constant 0 : index
    %c0_20 = arith.constant 0 : index
    %21 = vector.load %arg15[%c0_19, %c0_20] : memref<16x256xf32, #tpu.memory_space<vmem>>, vector<4x256xf32>
    tpu.vector_store %arg15[%c0_19, %c0_20], %20 {strides = array<i32>} : memref<16x256xf32, #tpu.memory_space<vmem>>, vector<4x256xf32>,
    %22 = vector.extract_strided_slice %20 {offsets = [0, 0], sizes = [2, 256], strides = [1, 1]} : vector<4x256xf32> to vector<2x256xf32>
    %23 = vector.extract_strided_slice %20 {offsets = [2, 0], sizes = [2, 256], strides = [1, 1]} : vector<4x256xf32> to vector<2x256xf32>
    %cst_21 = arith.constant 5.000000e-01 : f32
    %24 = vector.broadcast %cst_21 : f32 to vector<2x256xf32>
    %25 = arith.mulf %24, %23 : vector<2x256xf32>
    %26 = math.exp %25 : vector<2x256xf32>
    %27 = arith.mulf %1, %26 : vector<2x256xf32>
    %28 = arith.addf %22, %27 : vector<2x256xf32>
    %c0_22 = arith.constant 0 : index
    %c0_23 = arith.constant 0 : index
    %29 = vector.load %arg9[%c0_22, %c0_23] : memref<120x2xf32, #tpu.memory_space<vmem>>, vector<120x2xf32>
    %cst_24 = arith.constant dense<0.000000e+00> : vector<120x256xf32>
    %30 = tpu.matmul %29, %28, %cst_24 {dimension_numbers = #tpu.dot_dimension_numbers<[1], [0], [0], [1], [0, 0, 1, 1], [], []>} : vector<120x2xf32>, vector<2x256xf32>, vector<120x256xf32> -> vector<120x256xf32>
    %31 = vector.extract_strided_slice %30 {offsets = [0, 0], sizes = [50, 256], strides = [1, 1]} : vector<120x256xf32> to vector<50x256xf32>
    %c0_25 = arith.constant 0 : index
    %c0_26 = arith.constant 0 : index
    %32 = vector.load %arg10[%c0_25, %c0_26] : memref<50x1xf32, #tpu.memory_space<vmem>>, vector<50x1xf32>
    %33 = vector.broadcast %32 : vector<50x1xf32> to vector<50x256xf32>
    %34 = arith.addf %31, %33 : vector<50x256xf32>
    %cst_27 = arith.constant 0.000000e+00 : f32
    %35 = vector.broadcast %cst_27 : f32 to vector<50x256xf32>
    %36 = arith.maximumf %34, %35 : vector<50x256xf32>
    %c0_28 = arith.constant 0 : index
    %c0_29 = arith.constant 0 : index
    %37 = vector.load %arg11[%c0_28, %c0_29] : memref<50x50xf32, #tpu.memory_space<vmem>>, vector<50x50xf32>
    %cst_30 = arith.constant dense<0.000000e+00> : vector<50x256xf32>
    %38 = tpu.matmul %37, %36, %cst_30 {dimension_numbers = #tpu.dot_dimension_numbers<[1], [0], [0], [1], [0, 0, 1, 1], [], []>} : vector<50x50xf32>, vector<50x256xf32>, vector<50x256xf32> -> vector<50x256xf32>
    %39 = vector.extract_strided_slice %30 {offsets = [56, 0], sizes = [50, 256], strides = [1, 1]} : vector<120x256xf32> to vector<50x256xf32>
    %40 = arith.addf %38, %39 : vector<50x256xf32>
    %c0_31 = arith.constant 0 : index
    %c0_32 = arith.constant 0 : index
    %41 = vector.load %arg12[%c0_31, %c0_32] : memref<50x1xf32, #tpu.memory_space<vmem>>, vector<50x1xf32>
    %42 = vector.broadcast %41 : vector<50x1xf32> to vector<50x256xf32>
    %43 = arith.addf %40, %42 : vector<50x256xf32>
    %cst_33 = arith.constant 0.000000e+00 : f32
    %44 = vector.broadcast %cst_33 : f32 to vector<50x256xf32>
    %45 = arith.maximumf %43, %44 : vector<50x256xf32>
    %c0_34 = arith.constant 0 : index
    %c0_35 = arith.constant 0 : index
    %46 = vector.load %arg13[%c0_34, %c0_35] : memref<6x50xf32, #tpu.memory_space<vmem>>, vector<6x50xf32>
    %cst_36 = arith.constant dense<0.000000e+00> : vector<6x256xf32>
    %47 = tpu.matmul %46, %45, %cst_36 {dimension_numbers = #tpu.dot_dimension_numbers<[1], [0], [0], [1], [0, 0, 1, 1], [], []>} : vector<6x50xf32>, vector<50x256xf32>, vector<6x256xf32> -> vector<6x256xf32>
    %48 = vector.extract_strided_slice %30 {offsets = [112, 0], sizes = [6, 256], strides = [1, 1]} : vector<120x256xf32> to vector<6x256xf32>
    %49 = arith.addf %47, %48 : vector<6x256xf32>
    %c0_37 = arith.constant 0 : index
    %c0_38 = arith.constant 0 : index
    %50 = vector.load %arg14[%c0_37, %c0_38] : memref<6x1xf32, #tpu.memory_space<vmem>>, vector<6x1xf32>
    %51 = vector.broadcast %50 : vector<6x1xf32> to vector<6x256xf32>
    %52 = arith.addf %49, %51 : vector<6x256xf32>
    %c8 = arith.constant 8 : index
    %c0_39 = arith.constant 0 : index
    %53 = vector.load %arg15[%c8, %c0_39] : memref<16x256xf32, #tpu.memory_space<vmem>>, vector<6x256xf32>
    tpu.vector_store %arg15[%c8, %c0_39], %52 {strides = array<i32>} : memref<16x256xf32, #tpu.memory_space<vmem>>, vector<6x256xf32>,
    return
  }
  func.func @transform_0(%arg0: i32) -> (i32, i32) {
    %c0_i32 = arith.constant 0 : i32
    %c0_i32_0 = arith.constant 0 : i32
    return %c0_i32, %arg0 : i32, i32
  }
  func.func @transform_1(%arg0: i32) -> (i32, i32) {
    %c0_i32 = arith.constant 0 : i32
    %c0_i32_0 = arith.constant 0 : i32
    return %c0_i32, %arg0 : i32, i32
  }
  func.func @transform_2(%arg0: i32) -> (i32, i32) {
    %c0_i32 = arith.constant 0 : i32
    %c0_i32_0 = arith.constant 0 : i32
    %c0_i32_1 = arith.constant 0 : i32
    return %c0_i32, %c0_i32_0 : i32, i32
  }
  func.func @transform_3(%arg0: i32) -> (i32, i32) {
    %c0_i32 = arith.constant 0 : i32
    %c0_i32_0 = arith.constant 0 : i32
    %c0_i32_1 = arith.constant 0 : i32
    return %c0_i32, %c0_i32_0 : i32, i32
  }
  func.func @transform_4(%arg0: i32) -> (i32, i32) {
    %c0_i32 = arith.constant 0 : i32
    %c0_i32_0 = arith.constant 0 : i32
    %c0_i32_1 = arith.constant 0 : i32
    return %c0_i32, %c0_i32_0 : i32, i32
  }
  func.func @transform_5(%arg0: i32) -> (i32, i32) {
    %c0_i32 = arith.constant 0 : i32
    %c0_i32_0 = arith.constant 0 : i32
    %c0_i32_1 = arith.constant 0 : i32
    return %c0_i32, %c0_i32_0 : i32, i32
  }
  func.func @transform_6(%arg0: i32) -> (i32, i32) {
    %c0_i32 = arith.constant 0 : i32
    %c0_i32_0 = arith.constant 0 : i32
    %c0_i32_1 = arith.constant 0 : i32
    return %c0_i32, %c0_i32_0 : i32, i32
  }
  func.func @transform_7(%arg0: i32) -> (i32, i32) {
    %c0_i32 = arith.constant 0 : i32
    %c0_i32_0 = arith.constant 0 : i32
    %c0_i32_1 = arith.constant 0 : i32
    return %c0_i32, %c0_i32_0 : i32, i32
  }
  func.func @transform_8(%arg0: i32) -> (i32, i32) {
    %c0_i32 = arith.constant 0 : i32
    %c0_i32_0 = arith.constant 0 : i32
    %c0_i32_1 = arith.constant 0 : i32
    return %c0_i32, %c0_i32_0 : i32, i32
  }
  func.func @transform_9(%arg0: i32) -> (i32, i32) {
    %c0_i32 = arith.constant 0 : i32
    %c0_i32_0 = arith.constant 0 : i32
    %c0_i32_1 = arith.constant 0 : i32
    return %c0_i32, %c0_i32_0 : i32, i32
  }
  func.func @transform_10(%arg0: i32) -> (i32, i32) {
    %c0_i32 = arith.constant 0 : i32
    %c0_i32_0 = arith.constant 0 : i32
    %c0_i32_1 = arith.constant 0 : i32
    return %c0_i32, %c0_i32_0 : i32, i32
  }
  func.func @transform_11(%arg0: i32) -> (i32, i32) {
    %c0_i32 = arith.constant 0 : i32
    %c0_i32_0 = arith.constant 0 : i32
    %c0_i32_1 = arith.constant 0 : i32
    return %c0_i32, %c0_i32_0 : i32, i32
  }
  func.func @transform_12(%arg0: i32) -> (i32, i32) {
    %c0_i32 = arith.constant 0 : i32
    %c0_i32_0 = arith.constant 0 : i32
    %c0_i32_1 = arith.constant 0 : i32
    return %c0_i32, %c0_i32_0 : i32, i32
  }
  func.func @transform_13(%arg0: i32) -> (i32, i32) {
    %c0_i32 = arith.constant 0 : i32
    %c0_i32_0 = arith.constant 0 : i32
    %c0_i32_1 = arith.constant 0 : i32
    return %c0_i32, %c0_i32_0 : i32, i32
  }
  func.func @transform_14(%arg0: i32) -> (i32, i32) {
    %c0_i32 = arith.constant 0 : i32
    %c0_i32_0 = arith.constant 0 : i32
    return %c0_i32, %arg0 : i32, i32
  }
}

</mosaic_0001>

<bundles_post_ra>
// kernel: tpu_custom_call.1
= control target key start
LH: loop header
LB: loop body
LE: loop exit
PB: predicated region body
PF: predicated region fallthrough
CT: control target
= control target key end

     0   :  { %19 = vsyncpa [#allocation3], 0  ;;  %s2441_s0 = inlined_call_operand.vmem [shape: f32[6,1024], index: 0, kind: input, shape index: {}]   ;;  %s2442_s1 = inlined_call_operand.vmem [shape: f32[2,1024], index: 1, kind: input, shape index: {}]   ;;  %s2443_s2 = inlined_call_operand.vmem [shape: f32[50,6], index: 2, kind: input, shape index: {}]   ;;  %s2444_s3 = inlined_call_operand.vmem [shape: f32[50,1], index: 3, kind: input, shape index: {}]   ;;  %s2445_s4 = inlined_call_operand.vmem [shape: f32[50,50], index: 4, kind: input, shape index: {}]   ;;  %s2446_s5 = inlined_call_operand.vmem [shape: f32[50,1], index: 5, kind: input, shape index: {}]   ;;  %s2447_s6 = inlined_call_operand.vmem [shape: f32[4,50], index: 6, kind: input, shape index: {}]   ;;  %s2448_s7 = inlined_call_operand.vmem [shape: f32[4,1], index: 7, kind: input, shape index: {}]   ;;  %s2449_s8 = inlined_call_operand.vmem [shape: f32[120,2], index: 8, kind: input, shape index: {}]   ;;  %s2450_s9 = inlined_call_operand.vmem [shape: f32[50,1], index: 9, kind: input, shape index: {}]   ;;  %s2451_s10 = inlined_call_operand.vmem [shape: f32[50,50], index: 10, kind: input, shape index: {}]   ;;  %s2452_s11 = inlined_call_operand.vmem [shape: f32[50,1], index: 11, kind: input, shape index: {}]   ;;  %s2453_s12 = inlined_call_operand.vmem [shape: f32[6,50], index: 12, kind: input, shape index: {}]   ;;  %s2454_s13 = inlined_call_operand.vmem [shape: f32[6,1], index: 13, kind: input, shape index: {}]   ;;  %s2455_s14 = inlined_call_operand.hbm [shape: f32[16,1024], index: 14, kind: output, shape index: {}]  }
   0x1   :  { %21 = vsyncpa [#allocation3 + $0x1], 0  ;;  %s2023_s29 = smov 0   ;;  %s2025_s30 = smov 0  }
   0x2   :  { %s2027_s15 = smov 0   ;;  %s2029_s16 = smov 0  }
   0x3 LB: > { %2461 = sst [smem:[#allocation5_spill]] %s1927_s29  ;;  %s2044_s17 = sadd.s32 4294967295, %s1939_s16   ;;  %s1939_s16 = sphi %s2029_s16, %s2470_s16   ;;  %s1935_s15 = sphi %s2027_s15, %s2472_s15   ;;  %s1931_s30 = sphi %s2025_s30, %s2474_s30   ;;  %s1927_s29 = sphi %s2023_s29, %s2473_s29  }
   0x4   : > { %2462 = sst [smem:[#allocation6_spill]] %s1935_s15  ;;  %s1695_s18 = sadd.s32 4294967294, %s1939_s16  }
   0x5   : > { %s2048_s19 = sadd.s32 1, %s1939_s16   ;;  %s338_s20 = sadd.s32 1, %s1935_s15 }
   0x6   : > { %2463 = sst [smem:[#allocation7_spill]] %s2048_s19  ;;  %s335_s21 = ssub.s32 %s1939_s16, %s2048_s19 }
   0x7   : > { %p348_p0 = scmp.ne.s32.totalorder %s1935_s15, %s1931_s30  ;;  %p336_p1 = scmp.eq.s32.totalorder %s335_s21, 0 }
   0x8   : > { %p349_p2 = scmp.eq.s32.totalorder %s2044_s17, 3  ;;  %p354_p3 = scmp.ne.s32.totalorder %s1931_s30, %s1927_s29 }
   0x9   : > { %p355_p4 = scmp.eq.s32.totalorder %s1695_s18, 3  ;;  %p1698_p7 = scmp.ge.s32.totalorder %s1939_s16, 1 }
   0xa   : > { %s2059_s22 = scalar_select %p336_p1, %s1935_s15, %s338_s20  }
   0xb   : > { %p2061_p5 = por %p349_p2, %p348_p0  ;;  %p2065_p6 = por %p355_p4, %p354_p3 }
   0xc   : > { %2464 = sst [smem:[#allocation8_spill]] %s2059_s22  ;;  %p427_p8 = scmp.lt.s32.totalorder %s1939_s16, 5 }
   0xd   : > { %s2466_s24 = scalar_select %p2065_p6, 1, 0 }
   0xe   : > { %p428_p9 = pnand %p1698_p7, %p427_p8 }
   0xf   : > { %2467 = sst [smem:[#allocation9_spill]] %s2466_s24  ;;  %s1700_s25 = sshll.u32 (!%p428_p9), %s2044_s17, 1  ;;  %v1941_v0 = vmov (!%p428_p9), 0.0   ;;  %v1942_v1 = vmov (!%p428_p9), 0   ;;  %v501_v2 = vld [vmem:[%s2444_s3] sm:$0xff] (!%p428_p9)  ;;  %v503_v3 = vld [vmem:[%s2444_s3 + $0x10] sm:$0xff] (!%p428_p9) }
  0x10   : > { %431 = sbr.rel (%p428_p9) target bundleno = 1486 (0x5ce), region = 76  ;;  %p479_p10 = scmp.lt.s32.totalorder (!%p428_p9), %s1700_s25, 7  ;;  %636 = vmatprep.mubr.f32.mxu0 (!%p428_p9), %v1941_v0  ;;  %835 = vmatprep.mubr.f32.mxu1 (!%p428_p9), %v1941_v0  ;;  %v502_v4 = vld [vmem:[%s2444_s3 + $0x8] sm:$0xff] (!%p428_p9)  ;;  %vm565_vm0 = vcmask (!%p428_p9), 1045504   ;;  %v504_v5 = vld [vmem:[%s2444_s3 + $0x18] sm:$0xff] (!%p428_p9)  ;;  %v494_v8 = vld [vmem:[%s2443_s2] sm:$0xff] (!%p428_p9) }
  0x11   : > { %1871 = vset.pattern.permute.xlu0 (!%p428_p9), %v1942_v1  ;;  %1872 = vset.pattern.permute.xlu1 (!%p428_p9), %v1942_v1  ;;  %vm543_vm1 = vcmask (!%p428_p9), 48128   ;;  %v505_v9 = vld [vmem:[%s2444_s3 + $0x20] sm:$0xff] (!%p428_p9)  ;;  %v506_v10 = vld [vmem:[%s2444_s3 + $0x28] sm:$0xff] (!%p428_p9)  ;;  %v507_v12 = vld [vmem:[%s2444_s3 + $0x30] sm:$0x3] (!%p428_p9)  ;;  %vm764_vm2 = vcmask (!%p428_p9), 1041408  }
  0x12   : > { %510 = vperm.xlu0 (!%p428_p9), %1871, %v501_v2   ;;  %520 = vperm.xlu1 (!%p428_p9), %1872, %v503_v3   ;;  %v495_v11 = vld [vmem:[%s2443_s2 + $0x8] sm:$0xff] (!%p428_p9)  ;;  %v700_v13 = vld [vmem:[%s2446_s5] sm:$0xff] (!%p428_p9)  ;;  %v496_v14 = vld [vmem:[%s2443_s2 + $0x10] sm:$0xff] (!%p428_p9)  ;;  %vm742_vm3 = vcmask (!%p428_p9), 408576   ;;  %s475_s19 = sand.u32 (!%p428_p9), 1, %s1931_s30   ;;  %vm1028_vm4 = vcmask (!%p428_p9), 15360  }
  0x13   : > { %v701_v15 = vld [vmem:[%s2446_s5 + $0x8] sm:$0xff] (!%p428_p9)  ;;  %v702_v16 = vld [vmem:[%s2446_s5 + $0x10] sm:$0xff] (!%p428_p9)  ;;  %v497_v17 = vld [vmem:[%s2443_s2 + $0x18] sm:$0xff] (!%p428_p9)  ;;  %s1759_s21 = sshll.u32 (!%p428_p9), %s2044_s17, 8  ;;  %s2400_s17 = scalar_lea.sflag (!%p428_p9), [#allocation3], %s475_s19 }
  0x14   : > { %v703_v18 = vld [vmem:[%s2446_s5 + $0x18] sm:$0xff] (!%p428_p9)  ;;  %v704_v19 = vld [vmem:[%s2446_s5 + $0x20] sm:$0xff] (!%p428_p9)  ;;  %v705_v21 = vld [vmem:[%s2446_s5 + $0x28] sm:$0xff] (!%p428_p9)  ;;  %s2394_s28 = scalar_lea.hbm (!%p428_p9), %s2455_s14, %s1759_s21 }
  0x15   : > { %v498_v20 = vld [vmem:[%s2443_s2 + $0x20] sm:$0xff] (!%p428_p9)  ;;  %v706_v22 = vld [vmem:[%s2446_s5 + $0x30] sm:$0x3] (!%p428_p9)  ;;  %v499_v23 = vld [vmem:[%s2443_s2 + $0x28] sm:$0xff] (!%p428_p9) }
  0x16   : > { %515 = vperm.xlu0 (!%p428_p9), %1871, %v502_v4   ;;  %525 = vperm.xlu1 (!%p428_p9), %1872, %v504_v5   ;;  %v893_v24 = vld [vmem:[%s2448_s7] sm:$0xf] (!%p428_p9)  ;;  %v500_v26 = vld [vmem:[%s2443_s2 + $0x30] sm:$0x3] (!%p428_p9)  ;;  %v1236_v27 = vld [vmem:[%s2450_s9 + $0x8] sm:$0xff] (!%p428_p9) }
  0x17   : > { %s2476_s25 = smov (!%p479_p10, %s1700_s25), 7  ;;  %v1235_v25 = vld [vmem:[%s2450_s9] sm:$0xff]  ;;  %v1237_v28 = vld [vmem:[%s2450_s9 + $0x10] sm:$0xff]  ;;  %v1238_v29 = vld [vmem:[%s2450_s9 + $0x18] sm:$0xff] }
  0x18   : > { %s1701_s22 = sshll.u32 %s2476_s25, 3  ;;  %v1239_v30 = vld [vmem:[%s2450_s9 + $0x20] sm:$0xff]  ;;  %v1240_v31 = vld [vmem:[%s2450_s9 + $0x28] sm:$0xff]  ;;  %v1241_v32 = vld [vmem:[%s2450_s9 + $0x30] sm:$0x3] }
  0x19   : > { %s482_s24 = scalar_lea.vmem %s2441_s0, %s1701_s22  ;;  %v1446_v33 = vld [vmem:[%s2452_s11] sm:$0xff]  ;;  %v1447_v34 = vld [vmem:[%s2452_s11 + $0x8] sm:$0xff]  ;;  %v1448_v35 = vld [vmem:[%s2452_s11 + $0x10] sm:$0xff]  ;;  %s1699_s22 = sshll.u32 %s475_s19, 5 }
  0x1a   : > { %v492_v6 = vld [vmem:[%s482_s24 + $0x8] sm:$0x3f]  ;;  %v491_v7 = vld [vmem:[%s482_s24] sm:$0x3f]  ;;  %530 = vperm.xlu0 %1871, %v505_v9   ;;  %535 = vperm.xlu1 %1872, %v506_v10   ;;  %v1449_v36 = vld [vmem:[%s2452_s11 + $0x18] sm:$0xff]  ;;  %s2252_s29 = scalar_lea.vmem [#allocation2], %s1699_s22 }
  0x1b   : > { %1704 = vmatprep.subr.msk.mxu0 %vm565_vm0, %v492_v6  ;;  %v1450_v37 = vld [vmem:[%s2452_s11 + $0x20] sm:$0xff]  ;;  %v1451_v38 = vld [vmem:[%s2452_s11 + $0x28] sm:$0xff]  ;;  %v1452_v39 = vld [vmem:[%s2452_s11 + $0x30] sm:$0x3]  ;;  %s1703_s24 = sshll.u32 %s2476_s25, 1  ;;  %s1944_s25 = smov [#allocation2]  }
  0x1c   : > { %1705 = vmatpush1.msk.msra.mxu0 %vm565_vm0, %v491_v7  ;;  %v1597_v40 = vld [vmem:[%s2454_s13] sm:$0x3f]  ;;  %s488_s27 = scalar_lea.vmem %s2442_s1, %s1703_s24  ;;  %s1621_s24 = sshll.u32 %s2252_s29, 4  ;;  %s2389_s24 = int_to_ptr.vmem [resolvable:$true] %s1621_s24 }
  0x1d   : > { %1706 = vmatmul.mubr.msk.f32.vlgmr.msra.gmra.mrb[0].mxu0 %vm543_vm1, %v494_v8  ;;  %s1877_s18 = scalar_lea.vmem %s2389_s24, 512  ;;  %s1881_s20 = sshll.u32 %s1944_s25, 4  ;;  %s1882_s20 = int_to_ptr.vmem [resolvable:$false] %s1881_s20 }
  0x1e   : > { %642 = vmatprep.mubr.f32.mxu0 %v1941_v0  ;;  %540 = vperm.xlu0 %1871, %v507_v12   ;;  %p1878_p11 = scmp.ne.s32.totalorder %s2389_s24, %s1877_s18  ;;  %s1883_s15 = scalar_lea.vmem %s1882_s20, 1024 }
  0x1f   : > { %709 = vperm.xlu1 %1872, %v700_v13   ;;  %p1884_p0 = scmp.lt.s32.totalorder %s2389_s24, %s1882_s20  ;;  %p1885_p1 = scmp.lt.s32.totalorder %s1883_s15, %s1877_s18 }
  0x20   : > { %p1879_p12 = pnand %p1878_p11, %p2061_p5 }
  0x21   : > { %1707 = vmatmul.mubr.msk.f32.gmra.mrb[2].mxu0 %vm543_vm1, %v495_v11  ;;  %p1886_p2 = por %p1885_p1, %p1884_p0 }
  0x22   : > { %648 = vmatprep.mubr.f32.mxu0 %v1941_v0  ;;  %714 = vperm.xlu0 %1871, %v701_v15   ;;  %p1880_p13 = pneg %p1879_p12 }
  0x23   : > { %719 = vperm.xlu1 %1872, %v702_v16  }
  0x24   : > { %p1887_p3 = pnand %p1886_p2, %p1880_p13 }
  0x25   : > { %1708 = vmatmul.mubr.msk.f32.gmra.mrb[4].mxu0 %vm543_vm1, %v496_v14 }
  0x26   : > { %654 = vmatprep.mubr.f32.mxu0 %v1941_v0  ;;  %724 = vperm.xlu0 %1871, %v703_v18  }
  0x27   : > { %729 = vperm.xlu1 %1872, %v704_v19  }
  0x29   : > { %1709 = vmatmul.mubr.msk.f32.gmra.mrb[6].mxu0 %vm543_vm1, %v497_v17 }
  0x2a   : > { %660 = vmatprep.mubr.f32.mxu0 %v1941_v0  ;;  %734 = vperm.xlu0 %1871, %v705_v21  }
  0x2b   : > { %739 = vperm.xlu1 %1872, %v706_v22  }
  0x2d   : > { %1710 = vmatmul.mubr.msk.f32.gmra.mrb[8].mxu0 %vm543_vm1, %v498_v20 }
  0x2e   : > { %666 = vmatprep.mubr.f32.mxu0 %v1941_v0  ;;  %896 = vperm.xlu0 %1871, %v893_v24  }
  0x2f   : > { %1244 = vperm.xlu1 %1872, %v1235_v25  }
  0x31   : > { %1711 = vmatmul.mubr.msk.f32.gmra.mrb[10].mxu0 %vm543_vm1, %v499_v23 }
  0x32   : > { %672 = vmatprep.mubr.f32.mxu0 %v1941_v0  ;;  %1249 = vperm.xlu0 %1871, %v1236_v27  }
  0x33   : > { %1254 = vperm.xlu1 %1872, %v1237_v28  }
  0x35   : > { %1712 = vmatmul.mubr.msk.f32.gmra.mrb[12].mxu0 %vm543_vm1, %v500_v26 }
  0x36   : > { %972 = vmatprep.mubr.f32.mxu0 %v1941_v0  ;;  %1259 = vperm.xlu0 %1871, %v1238_v29  }
  0x37   : > { %1264 = vperm.xlu1 %1872, %v1239_v30  }
  0x3a   : > { %1269 = vperm.xlu0 %1871, %v1240_v31  }
  0x3b   : > { %1274 = vperm.xlu1 %1872, %v1241_v32  }
  0x3e   : > { %1455 = vperm.xlu0 %1871, %v1446_v33   ;;  %v693_v33 = vld [vmem:[%s2445_s4] sm:$0xff] }
  0x3f   : > { %1460 = vperm.xlu1 %1872, %v1447_v34   ;;  %v694_v34 = vld [vmem:[%s2445_s4 + $0x8] sm:$0xff] }
  0x42   : > { %1465 = vperm.xlu0 %1871, %v1448_v35   ;;  %v695_v35 = vld [vmem:[%s2445_s4 + $0x10] sm:$0xff] }
  0x43   : > { %1470 = vperm.xlu1 %1872, %v1449_v36   ;;  %v696_v36 = vld [vmem:[%s2445_s4 + $0x18] sm:$0xff] }
  0x46   : > { %1475 = vperm.xlu0 %1871, %v1450_v37   ;;  %v697_v37 = vld [vmem:[%s2445_s4 + $0x20] sm:$0xff] }
  0x47   : > { %1480 = vperm.xlu1 %1872, %v1451_v38   ;;  %v698_v38 = vld [vmem:[%s2445_s4 + $0x28] sm:$0xff] }
  0x4a   : > { %1485 = vperm.xlu0 %1871, %v1452_v39   ;;  %v699_v39 = vld [vmem:[%s2445_s4 + $0x30] sm:$0x3] }
  0x4b   : > { %1600 = vperm.xlu1 %1872, %v1597_v40  }
  0x91   : > { %v511_v41 = vpop.permute.xlu0 %510  ;;  %v521_v50 = vpop.permute.xlu1 %520 }
  0x95   : > { %v516_v45 = vpop.permute.xlu0 %515  ;;  %v526_v61 = vpop.permute.xlu1 %525 }
  0x99   : > { %v531_v11 = vpop.permute.xlu0 %530  ;;  %v536_v14 = vpop.permute.xlu1 %535 }
  0x9d   : > { %v541_v25 = vpop.permute.xlu0 %540 }
  0xf0   : > { %v638_v42 = vpop.f32.mrb[0].mxu0 }
  0xf1   : > { %v640_v43 = vpop.f32.mrb[1].mxu0  ;;  %v639_v44 = vadd.f32 %v638_v42, %v511_v41  ;;  %v710_v42 = vpop.permute.xlu1 %709 }
  0xf2   : > { %v641_v46 = vadd.f32 %v640_v43, %v511_v41 }
  0xf3   : > { %v679_v52 = vmax.f32 %v639_v44, 0.0  ;;  %v715_v44 = vpop.permute.xlu0 %714 }
  0xf4   : > { %v644_v47 = vpop.f32.mrb[2].mxu0  ;;  %v680_v54 = vmax.f32 %v641_v46, 0.0 }
  0xf5   : > { %v645_v48 = vadd.f32 %v644_v47, %v516_v45  ;;  %v646_v49 = vpop.f32.mrb[3].mxu0 }
  0xf6   : > { %v647_v51 = vadd.f32 %v646_v49, %v516_v45 }
  0xf7   : > { %v681_v53 = vmax.f32 %v645_v48, 0.0 }
  0xf8   : > { %v682_v55 = vmax.f32 %v647_v51, 0.0  ;;  %v650_v56 = vpop.f32.mrb[4].mxu0 }
  0xf9   : > { %v652_v57 = vpop.f32.mrb[5].mxu0  ;;  %v1762_v58 = vpack.c.bf16 %v681_v53, %v679_v52  ;;  %v651_v60 = vadd.f32 %v650_v56, %v521_v50 }
  0xfa   : > { %v1760_v59 = vpack.c.bf16 %v682_v55, %v680_v54  ;;  %v653_v62 = vadd.f32 %v652_v57, %v521_v50  ;;  %v720_v57 = vpop.permute.xlu1 %719 }
  0xfb   : > { %v683_v4 = vmax.f32 %v651_v60, 0.0  ;;  %v725_v60 = vpop.permute.xlu0 %724 }
  0xfc   : > { %v656_v63 = vpop.f32.mrb[6].mxu0  ;;  %1761 = vmatprep.subr.bf16.mxu1 %v1760_v59  ;;  %v684_v6 = vmax.f32 %v653_v62, 0.0 }
  0xfd   : > { %v657_v1 = vadd.f32 %v656_v63, %v526_v61  ;;  %v658_v2 = vpop.f32.mrb[7].mxu0  ;;  %1763 = vmatpush1.bf16.msra.mxu1 %v1762_v58 }
  0xfe   : > { %v659_v3 = vadd.f32 %v658_v2, %v526_v61 }
  0xff   : > { %v685_v5 = vmax.f32 %v657_v1, 0.0 }
 0x100   : > { %v686_v7 = vmax.f32 %v659_v3, 0.0  ;;  %v662_v8 = vpop.f32.mrb[8].mxu0 }
 0x101   : > { %v1766_v9 = vpack.c.bf16 %v685_v5, %v683_v4  ;;  %v664_v10 = vpop.f32.mrb[9].mxu0  ;;  %v663_v13 = vadd.f32 %v662_v8, %v531_v11 }
 0x102   : > { %v1764_v12 = vpack.c.bf16 %v686_v7, %v684_v6  ;;  %v665_v15 = vadd.f32 %v664_v10, %v531_v11  ;;  %v730_v10 = vpop.permute.xlu1 %729 }
 0x103   : > { %v687_v20 = vmax.f32 %v663_v13, 0.0  ;;  %v735_v13 = vpop.permute.xlu0 %734 }
 0x104   : > { %v668_v16 = vpop.f32.mrb[10].mxu0  ;;  %1765 = vmatprep.subr.bf16.mxu1 %v1764_v12  ;;  %v688_v22 = vmax.f32 %v665_v15, 0.0 }
 0x105   : > { %v669_v17 = vadd.f32 %v668_v16, %v536_v14  ;;  %v670_v18 = vpop.f32.mrb[11].mxu0  ;;  %1767 = vmatpush1.bf16.msra.mxu1 %v1766_v9 }
 0x106   : > { %v671_v19 = vadd.f32 %v670_v18, %v536_v14 }
 0x107   : > { %v689_v21 = vmax.f32 %v669_v17, 0.0 }
 0x108   : > { %v690_v23 = vmax.f32 %v671_v19, 0.0  ;;  %v674_v24 = vpop.f32.mrb[12].mxu0 }
 0x109   : > { %v1770_v26 = vpack.c.bf16 %v689_v21, %v687_v20  ;;  %v676_v27 = vpop.f32.mrb[13].mxu0  ;;  %v675_v30 = vadd.f32 %v674_v24, %v541_v25  ;;  %v740_v24 = vpop.permute.xlu1 %739 }
 0x10a   : > { %v1768_v28 = vpack.c.bf16 %v690_v23, %v688_v22  ;;  %v677_v29 = vadd.f32 %v676_v27, %v541_v25 }
 0x10b   : > { %v691_v32 = vmax.f32 %v675_v30, 0.0 }
 0x10c   : > { %v692_v31 = vmax.f32 %v677_v29, 0.0  ;;  %1769 = vmatprep.subr.bf16.mxu1 %v1768_v28 }
 0x10d   : > { %1771 = vmatpush1.bf16.msra.mxu1 %v1770_v26 }
 0x10e   : > { %1713 = vmatprep.subr.msk.mxu1 %vm764_vm2, %v692_v31 }
 0x111   : > { %1714 = vmatpush1.msk.msra.mxu1 %vm764_vm2, %v691_v32  ;;  %v892_v32 = vld [vmem:[%s2447_s6] sm:$0xf] }
 0x112   : > { %1715 = vmatmul.mubr.msk.f32.vlgmr.msra.gmra.mrb[0].mxu1 %vm742_vm3, %v693_v33  ;;  %v897_v33 = vpop.permute.xlu0 %896 }
 0x113   : > { %841 = vmatprep.mubr.f32.mxu1 %v1941_v0 }
 0x116   : > { %1716 = vmatmul.mubr.msk.f32.gmra.mrb[2].mxu1 %vm742_vm3, %v694_v34 }
 0x117   : > { %847 = vmatprep.mubr.f32.mxu1 %v1941_v0 }
 0x11a   : > { %1717 = vmatmul.mubr.msk.f32.gmra.mrb[4].mxu1 %vm742_vm3, %v695_v35 }
 0x11b   : > { %853 = vmatprep.mubr.f32.mxu1 %v1941_v0 }
 0x11e   : > { %1718 = vmatmul.mubr.msk.f32.gmra.mrb[6].mxu1 %vm742_vm3, %v696_v36 }
 0x11f   : > { %859 = vmatprep.mubr.f32.mxu1 %v1941_v0 }
 0x122   : > { %1719 = vmatmul.mubr.msk.f32.gmra.mrb[8].mxu1 %vm742_vm3, %v697_v37 }
 0x123   : > { %865 = vmatprep.mubr.f32.mxu1 %v1941_v0 }
 0x126   : > { %1720 = vmatmul.mubr.msk.f32.gmra.mrb[10].mxu1 %vm742_vm3, %v698_v38 }
 0x127   : > { %871 = vmatprep.mubr.f32.mxu1 %v1941_v0 }
 0x12a   : > { %1721 = vmatmul.mubr.msk.f32.gmra.mrb[12].mxu1 %vm742_vm3, %v699_v39 }
 0x12b   : > { %1168 = vmatprep.mubr.f32.mxu1 %v1941_v0 }
 0x1e5   : > { %v837_v40 = vpop.f32.mrb[0].mxu1 }
 0x1e6   : > { %v839_v41 = vpop.f32.mrb[1].mxu1  ;;  %v838_v43 = vadd.f32 %v837_v40, %v710_v42 }
 0x1e7   : > { %v840_v45 = vadd.f32 %v839_v41, %v710_v42  ;;  %v1943_v42 = vmov 1983009808  }
 0x1e8   : > { %v878_v50 = vmax.f32 %v838_v43, 0.0  ;;  %v991_v43 = vunpack.c.l.s4 %v1943_v42 }
 0x1e9   : > { %v843_v46 = vpop.f32.mrb[2].mxu1  ;;  %v879_v52 = vmax.f32 %v840_v45, 0.0 }
 0x1ea   : > { %v844_v47 = vadd.f32 %v843_v46, %v715_v44  ;;  %v845_v48 = vpop.f32.mrb[3].mxu1  ;;  %v992_v45 = vunpack.c.0.s8 %v991_v43 }
 0x1eb   : > { %v846_v49 = vadd.f32 %v845_v48, %v715_v44  ;;  %v993_v44 = vlaneseq }
 0x1ec   : > { %v880_v51 = vmax.f32 %v844_v47, 0.0 }
 0x1ed   : > { %v881_v53 = vmax.f32 %v846_v49, 0.0  ;;  %v849_v54 = vpop.f32.mrb[4].mxu1  ;;  %v994_v46 = vshrl.u32 %v993_v44, 7 }
 0x1ee   : > { %v1774_v55 = vpack.c.bf16 %v880_v51, %v878_v50  ;;  %v851_v56 = vpop.f32.mrb[5].mxu1  ;;  %v850_v59 = vadd.f32 %v849_v54, %v720_v57 }
 0x1ef   : > { %v1772_v58 = vpack.c.bf16 %v881_v53, %v879_v52  ;;  %v852_v61 = vadd.f32 %v851_v56, %v720_v57  ;;  %v995_v48 = vsub.s32 %v992_v45, %v994_v46  ;;  %v493_v52 = vld [vmem:[%s488_s27] sm:$0xf] }
 0x1f0   : > { %v882_v3 = vmax.f32 %v850_v59, 0.0  ;;  %v1013_v59 = vld [vmem:[%s2449_s8] sm:$0xff] }
 0x1f1   : > { %v855_v62 = vpop.f32.mrb[6].mxu1  ;;  %1773 = vmatprep.subr.bf16.mxu0 %v1772_v58  ;;  %v883_v5 = vmax.f32 %v852_v61, 0.0  ;;  %v1014_v61 = vld [vmem:[%s2449_s8 + $0x8] sm:$0xff] }
 0x1f2   : > { %v856_v63 = vadd.f32 %v855_v62, %v725_v60  ;;  %v857_v1 = vpop.f32.mrb[7].mxu1  ;;  %1775 = vmatpush1.bf16.msra.mxu0 %v1774_v55  ;;  %v1018_v62 = vld [vmem:[%s2449_s8 + $0x28] sm:$0xff] }
 0x1f3   : > { %v858_v2 = vadd.f32 %v857_v1, %v725_v60  ;;  %v1017_v60 = vld [vmem:[%s2449_s8 + $0x20] sm:$0xff]  ;;  %v1019_v1 = vld [vmem:[%s2449_s8 + $0x30] sm:$0xff] }
 0x1f4   : > { %v884_v4 = vmax.f32 %v856_v63, 0.0  ;;  %v1015_v63 = vld [vmem:[%s2449_s8 + $0x10] sm:$0xff] }
 0x1f5   : > { %v885_v6 = vmax.f32 %v858_v2, 0.0  ;;  %v861_v7 = vpop.f32.mrb[8].mxu1  ;;  %v1016_v2 = vld [vmem:[%s2449_s8 + $0x18] sm:$0xff] }
 0x1f6   : > { %v1778_v8 = vpack.c.bf16 %v884_v4, %v882_v3  ;;  %v863_v9 = vpop.f32.mrb[9].mxu1  ;;  %v862_v12 = vadd.f32 %v861_v7, %v730_v10  ;;  %v1020_v3 = vld [vmem:[%s2449_s8 + $0x38] sm:$0xff]  ;;  %v1021_v4 = vld [vmem:[%s2449_s8 + $0x40] sm:$0xff] }
 0x1f7   : > { %v1776_v11 = vpack.c.bf16 %v885_v6, %v883_v5  ;;  %v864_v14 = vadd.f32 %v863_v9, %v730_v10  ;;  %v1022_v5 = vld [vmem:[%s2449_s8 + $0x48] sm:$0xff]  ;;  %v1023_v6 = vld [vmem:[%s2449_s8 + $0x50] sm:$0xff]  ;;  %v1024_v7 = vld [vmem:[%s2449_s8 + $0x58] sm:$0xff]  ;;  %v1245_v10 = vpop.permute.xlu1 %1244 }
 0x1f8   : > { %v886_v19 = vmax.f32 %v862_v12, 0.0  ;;  %v1026_v9 = vld [vmem:[%s2449_s8 + $0x68] sm:$0xff] }
 0x1f9   : > { %v867_v15 = vpop.f32.mrb[10].mxu1  ;;  %1777 = vmatprep.subr.bf16.mxu0 %v1776_v11  ;;  %v887_v21 = vmax.f32 %v864_v14, 0.0  ;;  %v1250_v11 = vpop.permute.xlu0 %1249 }
 0x1fa   : > { %v868_v16 = vadd.f32 %v867_v15, %v735_v13  ;;  %v869_v17 = vpop.f32.mrb[11].mxu1  ;;  %1779 = vmatpush1.bf16.msra.mxu0 %v1778_v8  ;;  %v1025_v8 = vld [vmem:[%s2449_s8 + $0x60] sm:$0xff] }
 0x1fb   : > { %v870_v18 = vadd.f32 %v869_v17, %v735_v13  ;;  %v1255_v12 = vpop.permute.xlu1 %1254 }
 0x1fc   : > { %v888_v20 = vmax.f32 %v868_v16, 0.0 }
 0x1fd   : > { %v889_v22 = vmax.f32 %v870_v18, 0.0  ;;  %v873_v23 = vpop.f32.mrb[12].mxu1  ;;  %v1260_v13 = vpop.permute.xlu0 %1259 }
 0x1fe   : > { %v1782_v25 = vpack.c.bf16 %v888_v20, %v886_v19  ;;  %v875_v26 = vpop.f32.mrb[13].mxu1  ;;  %v874_v29 = vadd.f32 %v873_v23, %v740_v24 }
 0x1ff   : > { %v1780_v27 = vpack.c.bf16 %v889_v22, %v887_v21  ;;  %v876_v28 = vadd.f32 %v875_v26, %v740_v24  ;;  %v1265_v18 = vpop.permute.xlu1 %1264 }
 0x200   : > { %v890_v31 = vmax.f32 %v874_v29, 0.0 }
 0x201   : > { %v891_v30 = vmax.f32 %v876_v28, 0.0  ;;  %1781 = vmatprep.subr.bf16.mxu0 %v1780_v27  ;;  %v1270_v19 = vpop.permute.xlu0 %1269 }
 0x202   : > { %1783 = vmatpush1.bf16.msra.mxu0 %v1782_v25 }
 0x203   : > { %1722 = vmatprep.subr.msk.mxu0 %vm764_vm2, %v891_v30 }
 0x206   : > { %1723 = vmatpush1.msk.msra.mxu0 %vm764_vm2, %v890_v31 }
 0x207   : > { %1724 = vmatmul.mubr.msk.f32.vlgmr.msra.gmra.mrb[14].mxu0 %vm742_vm3, %v892_v32 }
 0x208   : > { %1144 = vmatprep.mubr.f32.mxu0 %v1941_v0 }
 0x2da   : > { %v974_v34 = vpop.f32.mrb[14].mxu0 }
 0x2db   : > { %v975_v35 = vadd.f32 %v974_v34, %v897_v33  ;;  %v976_v36 = vpop.f32.mrb[15].mxu0 }
 0x2dc   : > { %v977_v37 = vadd.f32 %v976_v36, %v897_v33 }
 0x2dd   : > { %979 = vst [vmem:[%s2252_s29] sm:$0xf] %v975_v35  ;;  %v981_v38 = vmul.f32 0.5, %v975_v35 }
 0x2de   : > { %980 = vst [vmem:[%s2252_s29 + $0x8] sm:$0xf] %v977_v37  ;;  %v982_v39 = vmul.f32 0.5, %v977_v37 }
 0x2df   : > { %v983_v40 = vmul.f32 1.442695, %v981_v38 }
 0x2e0   : > { %v985_v41 = vmul.f32 1.442695, %v982_v39 }
 0x2e1   : > { %1873 = vpow2.f32 %v983_v40 }
 0x2e2   : > { %1875 = vpow2.f32 %v985_v41 }
 0x2eb   : > { %v1874_v47 = vpop.eup %1873 }
 0x2ec   : > { %v1876_v49 = vpop.eup %1875 }
 0x2ed   : > { %v989_v50 = vcombine.low %v1874_v47, %v1876_v49 }
 0x2ef   : > { %v996_v51 = vrot.slane %v989_v50, %v995_v48 }
 0x2f1   : > { %v997_v53 = vcombine.high %v996_v51, %v996_v51 }
 0x2f3   : > { %v999_v54 = vmul.f32 %v997_v53, %v493_v52 }
 0x2f5   : > { %v1007_v55 = vrot.slane %v999_v54, %v995_v48 }
 0x2f7   : > { %v1008_v56 = vcombine.high %v1007_v55, %v1007_v55  ;;  %v1011_v57 = vadd.f32 %v1007_v55, %v975_v35 }
 0x2f9   : > { %v1012_v58 = vadd.f32 %v1008_v56, %v977_v37 }
 0x2fb   : > { %1725 = vmatprep.subr.msk.mxu0 %vm764_vm2, %v1012_v58  ;;  %1808 = vmatprep.subr.msk.mxu1 %vm764_vm2, %v1012_v58 }
 0x2fc   : > { %1726 = vmatpush1.msk.msra.mxu0 %vm764_vm2, %v1011_v57  ;;  %1809 = vmatpush1.msk.msra.mxu1 %vm764_vm2, %v1011_v57 }
 0x2fd   : > { %1727 = vmatmul.mubr.msk.f32.vlgmr.msra.gmra.mrb[16].mxu0 %vm1028_vm4, %v1013_v59  ;;  %1731 = vmatmul.mubr.msk.f32.vlgmr.msra.gmra.mrb[14].mxu1 %vm1028_vm4, %v1017_v60  ;;  %v1275_v60 = vpop.permute.xlu1 %1274 }
 0x2fe   : > { %1150 = vmatprep.mubr.f32.mxu0 %v1941_v0  ;;  %1174 = vmatprep.mubr.f32.mxu1 %v1941_v0 }
 0x301   : > { %1728 = vmatmul.mubr.msk.f32.gmra.mrb[18].mxu0 %vm1028_vm4, %v1014_v61  ;;  %1732 = vmatmul.mubr.msk.f32.gmra.mrb[16].mxu1 %vm1028_vm4, %v1018_v62 }
 0x302   : > { %1156 = vmatprep.mubr.f32.mxu0 %v1941_v0  ;;  %1180 = vmatprep.mubr.f32.mxu1 %v1941_v0 }
 0x305   : > { %1729 = vmatmul.mubr.msk.f32.gmra.mrb[20].mxu0 %vm1028_vm4, %v1015_v63  ;;  %1733 = vmatmul.mubr.msk.f32.gmra.mrb[18].mxu1 %vm1028_vm4, %v1019_v1 }
 0x306   : > { %1162 = vmatprep.mubr.f32.mxu0 %v1941_v0  ;;  %1186 = vmatprep.mubr.f32.mxu1 %v1941_v0 }
 0x309   : > { %1730 = vmatmul.mubr.msk.f32.gmra.mrb[22].mxu0 %vm1028_vm4, %v1016_v2  ;;  %1734 = vmatmul.mubr.msk.f32.gmra.mrb[20].mxu1 %vm1028_vm4, %v1020_v3  ;;  %v1305_v2 = vld [vmem:[%s2451_s10] sm:$0xff]  ;;  %v1306_v3 = vld [vmem:[%s2451_s10 + $0x8] sm:$0xff] }
 0x30a   : > { %1403 = vmatprep.mubr.f32.mxu0 %v1941_v0  ;;  %1192 = vmatprep.mubr.f32.mxu1 %v1941_v0 }
 0x30d   : > { %1735 = vmatmul.mubr.msk.f32.gmra.mrb[22].mxu1 %vm1028_vm4, %v1021_v4  ;;  %v1307_v4 = vld [vmem:[%s2451_s10 + $0x10] sm:$0xff] }
 0x30e   : > { %1198 = vmatprep.mubr.f32.mxu1 %v1941_v0 }
 0x311   : > { %1736 = vmatmul.mubr.msk.f32.gmra.mrb[24].mxu1 %vm1028_vm4, %v1022_v5  ;;  %v1308_v5 = vld [vmem:[%s2451_s10 + $0x18] sm:$0xff] }
 0x312   : > { %1204 = vmatprep.mubr.f32.mxu1 %v1941_v0 }
 0x315   : > { %1737 = vmatmul.mubr.msk.f32.gmra.mrb[26].mxu1 %vm1028_vm4, %v1023_v6  ;;  %v1309_v6 = vld [vmem:[%s2451_s10 + $0x20] sm:$0xff] }
 0x316   : > { %1210 = vmatprep.mubr.f32.mxu1 %v1941_v0 }
 0x319   : > { %1738 = vmatmul.mubr.msk.f32.gmra.mrb[28].mxu1 %vm1028_vm4, %v1024_v7  ;;  %v1310_v7 = vld [vmem:[%s2451_s10 + $0x28] sm:$0xff] }
 0x31a   : > { %1216 = vmatprep.mubr.f32.mxu1 %v1941_v0 }
 0x31d   : > { %1739 = vmatmul.mubr.msk.f32.gmra.mrb[30].mxu1 %vm1028_vm4, %v1025_v8  ;;  %v1311_v8 = vld [vmem:[%s2451_s10 + $0x30] sm:$0x3] }
 0x31e   : > { %1222 = vmatprep.mubr.f32.mxu1 %v1941_v0 }
 0x321   : > { %1740 = vmatmul.mubr.msk.f32.gmra.mrb[32].mxu1 %vm1028_vm4, %v1026_v9 }
 0x322   : > { %1228 = vmatprep.mubr.f32.mxu1 %v1941_v0 }
 0x3d0   : > { %v1146_v14 = vpop.f32.mrb[16].mxu0  ;;  %v1170_v15 = vpop.f32.mrb[14].mxu1 }
 0x3d1   : > { %v1148_v16 = vpop.f32.mrb[17].mxu0  ;;  %v1172_v17 = vpop.f32.mrb[15].mxu1  ;;  %v1277_v20 = vadd.f32 %v1245_v10, %v1146_v14  ;;  %v1285_v21 = vadd.f32 %v1265_v18, %v1170_v15 }
 0x3d2   : > { %v1278_v22 = vadd.f32 %v1245_v10, %v1148_v16  ;;  %v1286_v23 = vadd.f32 %v1265_v18, %v1172_v17 }
 0x3d3   : > { %v1291_v32 = vmax.f32 %v1277_v20, 0.0  ;;  %v1299_v33 = vmax.f32 %v1285_v21, 0.0 }
 0x3d4   : > { %v1152_v24 = vpop.f32.mrb[18].mxu0  ;;  %v1176_v25 = vpop.f32.mrb[16].mxu1  ;;  %v1292_v36 = vmax.f32 %v1278_v22, 0.0  ;;  %v1300_v37 = vmax.f32 %v1286_v23, 0.0 }
 0x3d5   : > { %v1279_v26 = vadd.f32 %v1250_v11, %v1152_v24  ;;  %v1287_v27 = vadd.f32 %v1270_v19, %v1176_v25  ;;  %v1154_v28 = vpop.f32.mrb[19].mxu0  ;;  %v1178_v29 = vpop.f32.mrb[17].mxu1 }
 0x3d6   : > { %v1280_v30 = vadd.f32 %v1250_v11, %v1154_v28  ;;  %v1288_v31 = vadd.f32 %v1270_v19, %v1178_v29 }
 0x3d7   : > { %v1293_v34 = vmax.f32 %v1279_v26, 0.0  ;;  %v1301_v35 = vmax.f32 %v1287_v27, 0.0  ;;  %v1456_v27 = vpop.permute.xlu0 %1455 }
 0x3d8   : > { %v1294_v38 = vmax.f32 %v1280_v30, 0.0  ;;  %v1302_v39 = vmax.f32 %v1288_v31, 0.0  ;;  %v1158_v40 = vpop.f32.mrb[20].mxu0  ;;  %v1182_v41 = vpop.f32.mrb[18].mxu1 }
 0x3d9   : > { %v1786_v42 = vpack.c.bf16 %v1293_v34, %v1291_v32  ;;  %v1794_v43 = vpack.c.bf16 %v1301_v35, %v1299_v33  ;;  %v1160_v44 = vpop.f32.mrb[21].mxu0  ;;  %v1184_v45 = vpop.f32.mrb[19].mxu1  ;;  %v1281_v48 = vadd.f32 %v1255_v12, %v1158_v40  ;;  %v1289_v62 = vadd.f32 %v1275_v60, %v1182_v41 }
 0x3da   : > { %v1784_v46 = vpack.c.bf16 %v1294_v38, %v1292_v36  ;;  %v1792_v47 = vpack.c.bf16 %v1302_v39, %v1300_v37  ;;  %v1282_v49 = vadd.f32 %v1255_v12, %v1160_v44  ;;  %v1290_v61 = vadd.f32 %v1275_v60, %v1184_v45  ;;  %v1461_v32 = vpop.permute.xlu1 %1460 }
 0x3db   : > { %v1295_v54 = vmax.f32 %v1281_v48, 0.0  ;;  %v1303_v1 = vmax.f32 %v1289_v62, 0.0 }
 0x3dc   : > { %v1164_v50 = vpop.f32.mrb[22].mxu0  ;;  %1785 = vmatprep.subr.bf16.mxu0 %v1784_v46  ;;  %v1296_v56 = vmax.f32 %v1282_v49, 0.0  ;;  %v1304_v63 = vmax.f32 %v1290_v61, 0.0  ;;  %v1188_v9 = vpop.f32.mrb[20].mxu1 }
 0x3dd   : > { %v1283_v51 = vadd.f32 %v1260_v13, %v1164_v50  ;;  %v1166_v52 = vpop.f32.mrb[23].mxu0  ;;  %1787 = vmatpush1.bf16.msra.mxu0 %v1786_v42  ;;  %v1190_v10 = vpop.f32.mrb[21].mxu1 }
 0x3de   : > { %v1284_v53 = vadd.f32 %v1260_v13, %v1166_v52  ;;  %v1466_v46 = vpop.permute.xlu0 %1465  ;;  %v1471_v52 = vpop.permute.xlu1 %1470 }
 0x3df   : > { %v1297_v55 = vmax.f32 %v1283_v51, 0.0 }
 0x3e0   : > { %v1298_v57 = vmax.f32 %v1284_v53, 0.0  ;;  %v1194_v11 = vpop.f32.mrb[22].mxu1 }
 0x3e1   : > { %v1790_v58 = vpack.c.bf16 %v1297_v55, %v1295_v54  ;;  %v1196_v12 = vpop.f32.mrb[23].mxu1 }
 0x3e2   : > { %v1788_v59 = vpack.c.bf16 %v1298_v57, %v1296_v56 }
 0x3e4   : > { %1789 = vmatprep.subr.bf16.mxu0 %v1788_v59  ;;  %v1200_v13 = vpop.f32.mrb[24].mxu1 }
 0x3e5   : > { %1791 = vmatpush1.bf16.msra.mxu0 %v1790_v58  ;;  %v1202_v14 = vpop.f32.mrb[25].mxu1 }
 0x3e6   : > { %1793 = vmatprep.subr.bf16.mxu0 %v1792_v47 }
 0x3e8   : > { %v1206_v15 = vpop.f32.mrb[26].mxu1 }
 0x3e9   : > { %1795 = vmatpush1.bf16.msra.mxu0 %v1794_v43  ;;  %v1208_v16 = vpop.f32.mrb[27].mxu1 }
 0x3ea   : > { %1742 = vmatprep.subr.msk.mxu0 %vm764_vm2, %v1304_v63 }
 0x3ec   : > { %v1212_v17 = vpop.f32.mrb[28].mxu1 }
 0x3ed   : > { %1743 = vmatpush1.msk.msra.mxu0 %vm764_vm2, %v1303_v1  ;;  %v1214_v18 = vpop.f32.mrb[29].mxu1 }
 0x3ee   : > { %1744 = vmatmul.mubr.msk.f32.vlgmr.msra.gmra.mrb[24].mxu0 %vm742_vm3, %v1305_v2 }
 0x3ef   : > { %1409 = vmatprep.mubr.f32.mxu0 %v1941_v0 }
 0x3f0   : > { %v1218_v19 = vpop.f32.mrb[30].mxu1 }
 0x3f1   : > { %v1220_v20 = vpop.f32.mrb[31].mxu1 }
 0x3f2   : > { %1745 = vmatmul.mubr.msk.f32.gmra.mrb[26].mxu0 %vm742_vm3, %v1306_v3  ;;  %v1476_v3 = vpop.permute.xlu0 %1475 }
 0x3f3   : > { %1415 = vmatprep.mubr.f32.mxu0 %v1941_v0 }
 0x3f4   : > { %v2371_v21 = vpop.f32.mrb[32].mxu1 }
 0x3f5   : > { %v2373_v22 = vpop.f32.mrb[33].mxu1 }
 0x3f6   : > { %1746 = vmatmul.mubr.msk.f32.gmra.mrb[28].mxu0 %vm742_vm3, %v1307_v4 }
 0x3f7   : > { %1421 = vmatprep.mubr.f32.mxu0 %v1941_v0 }
 0x3fa   : > { %1747 = vmatmul.mubr.msk.f32.gmra.mrb[30].mxu0 %vm742_vm3, %v1308_v5 }
 0x3fb   : > { %1427 = vmatprep.mubr.f32.mxu0 %v1941_v0 }
 0x3fe   : > { %1748 = vmatmul.mubr.msk.f32.gmra.mrb[32].mxu0 %vm742_vm3, %v1309_v6 }
 0x3ff   : > { %1433 = vmatprep.mubr.f32.mxu0 %v1941_v0 }
 0x402   : > { %1749 = vmatmul.mubr.msk.f32.gmra.mrb[34].mxu0 %vm742_vm3, %v1310_v7 }
 0x403   : > { %1439 = vmatprep.mubr.f32.mxu0 %v1941_v0 }
 0x406   : > { %1750 = vmatmul.mubr.msk.f32.gmra.mrb[36].mxu0 %vm742_vm3, %v1311_v8 }
 0x407   : > { %1590 = vmatprep.mubr.f32.mxu0 %v1941_v0  ;;  %v1027_v0 = vld [vmem:[%s2449_s8 + $0x70] sm:$0xff] }
 0x408   : > { %1741 = vmatmul.mubr.msk.f32.gmra.mrb[34].mxu1 %vm1028_vm4, %v1027_v0 }
 0x4c1   : > { %v1405_v23 = vpop.f32.mrb[24].mxu0 }
 0x4c2   : > { %v1406_v24 = vadd.f32 %v1405_v23, %v1188_v9  ;;  %v1407_v25 = vpop.f32.mrb[25].mxu0  ;;  %v1481_v9 = vpop.permute.xlu1 %1480 }
 0x4c3   : > { %v1408_v26 = vadd.f32 %v1407_v25, %v1190_v10 }
 0x4c4   : > { %v1488_v29 = vadd.f32 %v1456_v27, %v1406_v24 }
 0x4c5   : > { %v1411_v28 = vpop.f32.mrb[26].mxu0  ;;  %v1489_v33 = vadd.f32 %v1456_v27, %v1408_v26 }
 0x4c6   : > { %v1412_v30 = vadd.f32 %v1411_v28, %v1194_v11  ;;  %v1413_v31 = vpop.f32.mrb[27].mxu0  ;;  %v1502_v38 = vmax.f32 %v1488_v29, 0.0 }
 0x4c7   : > { %v1414_v34 = vadd.f32 %v1413_v31, %v1196_v12  ;;  %v1503_v42 = vmax.f32 %v1489_v33, 0.0 }
 0x4c8   : > { %v1490_v35 = vadd.f32 %v1461_v32, %v1412_v30 }
 0x4c9   : > { %v1491_v36 = vadd.f32 %v1461_v32, %v1414_v34  ;;  %v1417_v37 = vpop.f32.mrb[28].mxu0  ;;  %v1601_v34 = vpop.permute.xlu1 %1600 }
 0x4ca   : > { %v1504_v39 = vmax.f32 %v1490_v35, 0.0  ;;  %v1418_v40 = vadd.f32 %v1417_v37, %v1200_v13  ;;  %v1419_v41 = vpop.f32.mrb[29].mxu0 }
 0x4cb   : > { %v1505_v43 = vmax.f32 %v1491_v36, 0.0  ;;  %v1420_v44 = vadd.f32 %v1419_v41, %v1202_v14 }
 0x4cc   : > { %v1798_v45 = vpack.c.bf16 %v1504_v39, %v1502_v38  ;;  %v1492_v49 = vadd.f32 %v1466_v46, %v1418_v40 }
 0x4cd   : > { %v1423_v47 = vpop.f32.mrb[30].mxu0  ;;  %v1796_v48 = vpack.c.bf16 %v1505_v43, %v1503_v42  ;;  %v1493_v53 = vadd.f32 %v1466_v46, %v1420_v44 }
 0x4ce   : > { %v1424_v50 = vadd.f32 %v1423_v47, %v1206_v15  ;;  %v1425_v51 = vpop.f32.mrb[31].mxu0  ;;  %v1506_v58 = vmax.f32 %v1492_v49, 0.0 }
 0x4cf   : > { %v1426_v54 = vadd.f32 %v1425_v51, %v1208_v16  ;;  %1797 = vmatprep.subr.bf16.mxu0 %v1796_v48  ;;  %v1507_v62 = vmax.f32 %v1493_v53, 0.0 }
 0x4d0   : > { %v1494_v55 = vadd.f32 %v1471_v52, %v1424_v50  ;;  %1799 = vmatpush1.bf16.msra.mxu0 %v1798_v45 }
 0x4d1   : > { %v1495_v56 = vadd.f32 %v1471_v52, %v1426_v54  ;;  %v1429_v57 = vpop.f32.mrb[32].mxu0 }
 0x4d2   : > { %v1508_v59 = vmax.f32 %v1494_v55, 0.0  ;;  %v1430_v60 = vadd.f32 %v1429_v57, %v1212_v17  ;;  %v1431_v61 = vpop.f32.mrb[33].mxu0 }
 0x4d3   : > { %v1509_v63 = vmax.f32 %v1495_v56, 0.0  ;;  %v1432_v1 = vadd.f32 %v1431_v61, %v1214_v18 }
 0x4d4   : > { %v1802_v2 = vpack.c.bf16 %v1508_v59, %v1506_v58  ;;  %v1496_v6 = vadd.f32 %v1476_v3, %v1430_v60 }
 0x4d5   : > { %v1435_v4 = vpop.f32.mrb[34].mxu0  ;;  %v1800_v5 = vpack.c.bf16 %v1509_v63, %v1507_v62  ;;  %v1497_v10 = vadd.f32 %v1476_v3, %v1432_v1 }
 0x4d6   : > { %v1436_v7 = vadd.f32 %v1435_v4, %v1218_v19  ;;  %v1437_v8 = vpop.f32.mrb[35].mxu0  ;;  %v1510_v15 = vmax.f32 %v1496_v6, 0.0  ;;  %v1486_v19 = vpop.permute.xlu0 %1485 }
 0x4d7   : > { %v1438_v11 = vadd.f32 %v1437_v8, %v1220_v20  ;;  %1801 = vmatprep.subr.bf16.mxu0 %v1800_v5  ;;  %v1511_v0 = vmax.f32 %v1497_v10, 0.0 }
 0x4d8   : > { %v1498_v12 = vadd.f32 %v1481_v9, %v1436_v7  ;;  %1803 = vmatpush1.bf16.msra.mxu0 %v1802_v2 }
 0x4d9   : > { %v1499_v13 = vadd.f32 %v1481_v9, %v1438_v11  ;;  %v1441_v14 = vpop.f32.mrb[36].mxu0 }
 0x4da   : > { %v1512_v16 = vmax.f32 %v1498_v12, 0.0  ;;  %v1442_v17 = vadd.f32 %v1441_v14, %v2371_v21  ;;  %v1443_v18 = vpop.f32.mrb[37].mxu0  ;;  %v1516_v21 = vld [vmem:[%s2453_s12] sm:$0x3f] }
 0x4db   : > { %v1513_v23 = vmax.f32 %v1499_v13, 0.0  ;;  %v1444_v24 = vadd.f32 %v1443_v18, %v2373_v22  ;;  %v1230_v22 = vpop.f32.mrb[34].mxu1 }
 0x4dc   : > { %v1806_v25 = vpack.c.bf16 %v1512_v16, %v1510_v15  ;;  %v1500_v27 = vadd.f32 %v1486_v19, %v1442_v17  ;;  %v1232_v30 = vpop.f32.mrb[35].mxu1 }
 0x4dd   : > { %v1501_v26 = vadd.f32 %v1486_v19, %v1444_v24  ;;  %v1804_v20 = vpack.c.bf16 %v1513_v23, %v1511_v0 }
 0x4de   : > { %v1514_v29 = vmax.f32 %v1500_v27, 0.0 }
 0x4df   : > { %v1515_v28 = vmax.f32 %v1501_v26, 0.0  ;;  %1805 = vmatprep.subr.bf16.mxu0 %v1804_v20 }
 0x4e0   : > { %1807 = vmatpush1.bf16.msra.mxu0 %v1806_v25 }
 0x4e1   : > { %1751 = vmatprep.subr.msk.mxu0 %vm764_vm2, %v1515_v28 }
 0x4e4   : > { %1752 = vmatpush1.msk.msra.mxu0 %vm764_vm2, %v1514_v29 }
 0x4e5   : > { %1753 = vmatmul.mubr.msk.f32.vlgmr.msra.gmra.mrb[38].mxu0 %vm742_vm3, %v1516_v21 }
 0x5b8   : > { %v1592_v31 = vpop.f32.mrb[38].mxu0 }
 0x5b9   : > { %v1593_v32 = vadd.f32 %v1592_v31, %v1230_v22  ;;  %v1594_v33 = vpop.f32.mrb[39].mxu0 }
 0x5ba   : > { %v1595_v35 = vadd.f32 %v1594_v33, %v1232_v30 }
 0x5bb   : > { %v1603_v36 = vadd.f32 %v1601_v34, %v1593_v32 }
 0x5bc   : > { %v1604_v37 = vadd.f32 %v1601_v34, %v1595_v35 }
 0x5bd   : > { %1605 = vst [vmem:[%s2252_s29 + $0x10] sm:$0x3f] %v1603_v36 }
 0x5be   : > { %1606 = vst [vmem:[%s2252_s29 + $0x18] sm:$0x3f] %v1604_v37 }
 0x5bf   : > { %1890 = shalt.err (!%p1887_p3)
}
 0x5c0   : > { %s1891_s19 = scalar_lea.hbm %s2394_s28, 512  ;;  %s1895_s21 = scalar_lea.hbm %s2455_s14, 2048 }
 0x5c1   : > { %p1892_p4 = scmp.ne.s32.totalorder %s2394_s28, %s1891_s19  ;;  %p1896_p9 = scmp.lt.u32.totalorder %s2394_s28, %s2455_s14 }
 0x5c2   : > { %p1897_p10 = scmp.lt.u32.totalorder %s1895_s21, %s1891_s19  ;;  %p1899_p12 = scmp.lt.u32.totalorder %s1891_s19, %s2394_s28 }
 0x5c3   : > { %p1893_p7 = pnand %p1892_p4, %p2061_p5 }
 0x5c4   : > { %p1898_p11 = por %p1897_p10, %p1896_p9 }
 0x5c5   : > { %p1894_p8 = pneg %p1893_p7 }
 0x5c6   : > { %p1900_p13 = por %p1899_p12, %p1898_p11 }
 0x5c8   : > { %p1901_p0 = pnand %p1900_p13, %p1894_p8 }
 0x5ca   : > { %1904 = shalt.err (!%p1901_p0)
}
 0x5cb   : > { %s1945_s18 = smov 256   ;;  %s1946_s25 = smov 1024  }
 0x5cc   : > { %s1947_s20 = smov 16  }
 0x5cd   : > { %1826 = dma.vmem_to_hbm [thread:$0]  (%p2061_p5), %s2389_s24, 512, %s2394_s28, %s2400_s17, %s1945_s18, %s1946_s25, %s1947_s20  }
 0x5ce PF: > { %s2468_s15 = sld [smem:[#allocation5_spill]]  ;;  %p1832_p1 = scmp.ge.s32.totalorder %s1939_s16, 2 }
 0x5d0   : > { %p1829_p2 = pnand %p1832_p1, %p2065_p6 }
 0x5d4   : > { %s1636_s22 = sand.u32 1, %s2468_s15  }
 0x5d5   : > { %s1637_s19 = scalar_lea.sflag [#allocation3], %s1636_s22 }
 0x5d6   : > { %1922 = dma.done.wait (!%p1829_p2), %s1637_s19, 512  }
 0x5d7   : > { %1924 = vsyncadd (!%p1829_p2), %s1637_s19, 4294966784  ;;  %s2470_s16 = sld [smem:[#allocation7_spill]]  ;;  %s2471_s21 = sld [smem:[#allocation6_spill]] }
 0x5d8   : > { %s2472_s15 = sld [smem:[#allocation8_spill]]  ;;  %s2473_s29 = smov %s1931_s30 }
 0x5dd   : > { %p24_p3 = scmp.ge.s32.totalorder %s2470_s16, 6   ;;  %s2474_s30 = smov %s2471_s21 }
 0x5df   :  { %26 = sbr.rel (!%p24_p3) target bundleno = 3 (0x3), region = 114 }
 0x5e6   :  { %1642 = vsyncpa [#allocation3], 1 }
 0x5e7   :  { %1644 = vsyncpa [#allocation3 + $0x1], 1 }

// kernel: tpu_custom_call.1
= control target key start
LH: loop header
LB: loop body
LE: loop exit
PB: predicated region body
PF: predicated region fallthrough
CT: control target
= control target key end

     0   :  { %19 = vsyncpa [#allocation3], 0  ;;  %s2441_s0 = inlined_call_operand.vmem [shape: f32[6,1024], index: 0, kind: input, shape index: {}]   ;;  %s2442_s1 = inlined_call_operand.vmem [shape: f32[2,1024], index: 1, kind: input, shape index: {}]   ;;  %s2443_s2 = inlined_call_operand.vmem [shape: f32[50,6], index: 2, kind: input, shape index: {}]   ;;  %s2444_s3 = inlined_call_operand.vmem [shape: f32[50,1], index: 3, kind: input, shape index: {}]   ;;  %s2445_s4 = inlined_call_operand.vmem [shape: f32[50,50], index: 4, kind: input, shape index: {}]   ;;  %s2446_s5 = inlined_call_operand.vmem [shape: f32[50,1], index: 5, kind: input, shape index: {}]   ;;  %s2447_s6 = inlined_call_operand.vmem [shape: f32[4,50], index: 6, kind: input, shape index: {}]   ;;  %s2448_s7 = inlined_call_operand.vmem [shape: f32[4,1], index: 7, kind: input, shape index: {}]   ;;  %s2449_s8 = inlined_call_operand.vmem [shape: f32[120,2], index: 8, kind: input, shape index: {}]   ;;  %s2450_s9 = inlined_call_operand.vmem [shape: f32[50,1], index: 9, kind: input, shape index: {}]   ;;  %s2451_s10 = inlined_call_operand.vmem [shape: f32[50,50], index: 10, kind: input, shape index: {}]   ;;  %s2452_s11 = inlined_call_operand.vmem [shape: f32[50,1], index: 11, kind: input, shape index: {}]   ;;  %s2453_s12 = inlined_call_operand.vmem [shape: f32[6,50], index: 12, kind: input, shape index: {}]   ;;  %s2454_s13 = inlined_call_operand.vmem [shape: f32[6,1], index: 13, kind: input, shape index: {}]   ;;  %s2455_s14 = inlined_call_operand.hbm [shape: f32[16,1024], index: 14, kind: output, shape index: {}]  }
   0x1   :  { %21 = vsyncpa [#allocation3 + $0x1], 0  ;;  %s2023_s29 = smov 0   ;;  %s2025_s30 = smov 0  }
   0x2   :  { %s2027_s15 = smov 0   ;;  %s2029_s16 = smov 0  }
   0x3 LB: > { %2461 = sst [smem:[#allocation5_spill]] %s1927_s29  ;;  %s2044_s17 = sadd.s32 4294967295, %s1939_s16   ;;  %s1939_s16 = sphi %s2029_s16, %s2470_s16   ;;  %s1935_s15 = sphi %s2027_s15, %s2472_s15   ;;  %s1931_s30 = sphi %s2025_s30, %s2474_s30   ;;  %s1927_s29 = sphi %s2023_s29, %s2473_s29  }
   0x4   : > { %2462 = sst [smem:[#allocation6_spill]] %s1935_s15  ;;  %s1695_s18 = sadd.s32 4294967294, %s1939_s16  }
   0x5   : > { %s2048_s19 = sadd.s32 1, %s1939_s16   ;;  %s338_s20 = sadd.s32 1, %s1935_s15 }
   0x6   : > { %2463 = sst [smem:[#allocation7_spill]] %s2048_s19  ;;  %s335_s21 = ssub.s32 %s1939_s16, %s2048_s19 }
   0x7   : > { %p348_p0 = scmp.ne.s32.totalorder %s1935_s15, %s1931_s30  ;;  %p336_p1 = scmp.eq.s32.totalorder %s335_s21, 0 }
   0x8   : > { %p349_p2 = scmp.eq.s32.totalorder %s2044_s17, 3  ;;  %p354_p3 = scmp.ne.s32.totalorder %s1931_s30, %s1927_s29 }
   0x9   : > { %p355_p4 = scmp.eq.s32.totalorder %s1695_s18, 3  ;;  %p1698_p7 = scmp.ge.s32.totalorder %s1939_s16, 1 }
   0xa   : > { %s2059_s22 = scalar_select %p336_p1, %s1935_s15, %s338_s20  }
   0xb   : > { %p2061_p5 = por %p349_p2, %p348_p0  ;;  %p2065_p6 = por %p355_p4, %p354_p3 }
   0xc   : > { %2464 = sst [smem:[#allocation8_spill]] %s2059_s22  ;;  %p427_p8 = scmp.lt.s32.totalorder %s1939_s16, 5 }
   0xd   : > { %s2466_s24 = scalar_select %p2065_p6, 1, 0 }
   0xe   : > { %p428_p9 = pnand %p1698_p7, %p427_p8 }
   0xf   : > { %2467 = sst [smem:[#allocation9_spill]] %s2466_s24  ;;  %s1700_s25 = sshll.u32 (!%p428_p9), %s2044_s17, 1  ;;  %v1941_v0 = vmov (!%p428_p9), 0.0   ;;  %v1942_v1 = vmov (!%p428_p9), 0   ;;  %v501_v2 = vld [vmem:[%s2444_s3] sm:$0xff] (!%p428_p9)  ;;  %v503_v3 = vld [vmem:[%s2444_s3 + $0x10] sm:$0xff] (!%p428_p9) }
  0x10   : > { %431 = sbr.rel (%p428_p9) target bundleno = 1486 (0x5ce), region = 76  ;;  %p479_p10 = scmp.lt.s32.totalorder (!%p428_p9), %s1700_s25, 7  ;;  %636 = vmatprep.mubr.f32.mxu0 (!%p428_p9), %v1941_v0  ;;  %835 = vmatprep.mubr.f32.mxu1 (!%p428_p9), %v1941_v0  ;;  %v502_v4 = vld [vmem:[%s2444_s3 + $0x8] sm:$0xff] (!%p428_p9)  ;;  %vm565_vm0 = vcmask (!%p428_p9), 1045504   ;;  %v504_v5 = vld [vmem:[%s2444_s3 + $0x18] sm:$0xff] (!%p428_p9)  ;;  %v494_v8 = vld [vmem:[%s2443_s2] sm:$0xff] (!%p428_p9) }
  0x11   : > { %1871 = vset.pattern.permute.xlu0 (!%p428_p9), %v1942_v1  ;;  %1872 = vset.pattern.permute.xlu1 (!%p428_p9), %v1942_v1  ;;  %vm543_vm1 = vcmask (!%p428_p9), 48128   ;;  %v505_v9 = vld [vmem:[%s2444_s3 + $0x20] sm:$0xff] (!%p428_p9)  ;;  %v506_v10 = vld [vmem:[%s2444_s3 + $0x28] sm:$0xff] (!%p428_p9)  ;;  %v507_v12 = vld [vmem:[%s2444_s3 + $0x30] sm:$0x3] (!%p428_p9)  ;;  %vm764_vm2 = vcmask (!%p428_p9), 1041408  }
  0x12   : > { %510 = vperm.xlu0 (!%p428_p9), %1871, %v501_v2   ;;  %520 = vperm.xlu1 (!%p428_p9), %1872, %v503_v3   ;;  %v495_v11 = vld [vmem:[%s2443_s2 + $0x8] sm:$0xff] (!%p428_p9)  ;;  %v700_v13 = vld [vmem:[%s2446_s5] sm:$0xff] (!%p428_p9)  ;;  %v496_v14 = vld [vmem:[%s2443_s2 + $0x10] sm:$0xff] (!%p428_p9)  ;;  %vm742_vm3 = vcmask (!%p428_p9), 408576   ;;  %s475_s19 = sand.u32 (!%p428_p9), 1, %s1931_s30   ;;  %vm1028_vm4 = vcmask (!%p428_p9), 15360  }
  0x13   : > { %v701_v15 = vld [vmem:[%s2446_s5 + $0x8] sm:$0xff] (!%p428_p9)  ;;  %v702_v16 = vld [vmem:[%s2446_s5 + $0x10] sm:$0xff] (!%p428_p9)  ;;  %v497_v17 = vld [vmem:[%s2443_s2 + $0x18] sm:$0xff] (!%p428_p9)  ;;  %s1759_s21 = sshll.u32 (!%p428_p9), %s2044_s17, 8  ;;  %s2400_s17 = scalar_lea.sflag (!%p428_p9), [#allocation3], %s475_s19 }
  0x14   : > { %v703_v18 = vld [vmem:[%s2446_s5 + $0x18] sm:$0xff] (!%p428_p9)  ;;  %v704_v19 = vld [vmem:[%s2446_s5 + $0x20] sm:$0xff] (!%p428_p9)  ;;  %v705_v21 = vld [vmem:[%s2446_s5 + $0x28] sm:$0xff] (!%p428_p9)  ;;  %s2394_s28 = scalar_lea.hbm (!%p428_p9), %s2455_s14, %s1759_s21 }
  0x15   : > { %v498_v20 = vld [vmem:[%s2443_s2 + $0x20] sm:$0xff] (!%p428_p9)  ;;  %v706_v22 = vld [vmem:[%s2446_s5 + $0x30] sm:$0x3] (!%p428_p9)  ;;  %v499_v23 = vld [vmem:[%s2443_s2 + $0x28] sm:$0xff] (!%p428_p9) }
  0x16   : > { %515 = vperm.xlu0 (!%p428_p9), %1871, %v502_v4   ;;  %525 = vperm.xlu1 (!%p428_p9), %1872, %v504_v5   ;;  %v893_v24 = vld [vmem:[%s2448_s7] sm:$0xf] (!%p428_p9)  ;;  %v500_v26 = vld [vmem:[%s2443_s2 + $0x30] sm:$0x3] (!%p428_p9)  ;;  %v1236_v27 = vld [vmem:[%s2450_s9 + $0x8] sm:$0xff] (!%p428_p9) }
  0x17   : > { %s2476_s25 = smov (!%p479_p10, %s1700_s25), 7  ;;  %v1235_v25 = vld [vmem:[%s2450_s9] sm:$0xff]  ;;  %v1237_v28 = vld [vmem:[%s2450_s9 + $0x10] sm:$0xff]  ;;  %v1238_v29 = vld [vmem:[%s2450_s9 + $0x18] sm:$0xff] }
  0x18   : > { %s1701_s22 = sshll.u32 %s2476_s25, 3  ;;  %v1239_v30 = vld [vmem:[%s2450_s9 + $0x20] sm:$0xff]  ;;  %v1240_v31 = vld [vmem:[%s2450_s9 + $0x28] sm:$0xff]  ;;  %v1241_v32 = vld [vmem:[%s2450_s9 + $0x30] sm:$0x3] }
  0x19   : > { %s482_s24 = scalar_lea.vmem %s2441_s0, %s1701_s22  ;;  %v1446_v33 = vld [vmem:[%s2452_s11] sm:$0xff]  ;;  %v1447_v34 = vld [vmem:[%s2452_s11 + $0x8] sm:$0xff]  ;;  %v1448_v35 = vld [vmem:[%s2452_s11 + $0x10] sm:$0xff]  ;;  %s1699_s22 = sshll.u32 %s475_s19, 5 }
  0x1a   : > { %v492_v6 = vld [vmem:[%s482_s24 + $0x8] sm:$0x3f]  ;;  %v491_v7 = vld [vmem:[%s482_s24] sm:$0x3f]  ;;  %530 = vperm.xlu0 %1871, %v505_v9   ;;  %535 = vperm.xlu1 %1872, %v506_v10   ;;  %v1449_v36 = vld [vmem:[%s2452_s11 + $0x18] sm:$0xff]  ;;  %s2252_s29 = scalar_lea.vmem [#allocation2], %s1699_s22 }
  0x1b   : > { %1704 = vmatprep.subr.msk.mxu0 %vm565_vm0, %v492_v6  ;;  %v1450_v37 = vld [vmem:[%s2452_s11 + $0x20] sm:$0xff]  ;;  %v1451_v38 = vld [vmem:[%s2452_s11 + $0x28] sm:$0xff]  ;;  %v1452_v39 = vld [vmem:[%s2452_s11 + $0x30] sm:$0x3]  ;;  %s1703_s24 = sshll.u32 %s2476_s25, 1  ;;  %s1944_s25 = smov [#allocation2]  }
  0x1c   : > { %1705 = vmatpush1.msk.msra.mxu0 %vm565_vm0, %v491_v7  ;;  %v1597_v40 = vld [vmem:[%s2454_s13] sm:$0x3f]  ;;  %s488_s27 = scalar_lea.vmem %s2442_s1, %s1703_s24  ;;  %s1621_s24 = sshll.u32 %s2252_s29, 4  ;;  %s2389_s24 = int_to_ptr.vmem [resolvable:$true] %s1621_s24 }
  0x1d   : > { %1706 = vmatmul.mubr.msk.f32.vlgmr.msra.gmra.mrb[0].mxu0 %vm543_vm1, %v494_v8  ;;  %s1877_s18 = scalar_lea.vmem %s2389_s24, 512  ;;  %s1881_s20 = sshll.u32 %s1944_s25, 4  ;;  %s1882_s20 = int_to_ptr.vmem [resolvable:$false] %s1881_s20 }
  0x1e   : > { %642 = vmatprep.mubr.f32.mxu0 %v1941_v0  ;;  %540 = vperm.xlu0 %1871, %v507_v12   ;;  %p1878_p11 = scmp.ne.s32.totalorder %s2389_s24, %s1877_s18  ;;  %s1883_s15 = scalar_lea.vmem %s1882_s20, 1024 }
  0x1f   : > { %709 = vperm.xlu1 %1872, %v700_v13   ;;  %p1884_p0 = scmp.lt.s32.totalorder %s2389_s24, %s1882_s20  ;;  %p1885_p1 = scmp.lt.s32.totalorder %s1883_s15, %s1877_s18 }
  0x20   : > { %p1879_p12 = pnand %p1878_p11, %p2061_p5 }
  0x21   : > { %1707 = vmatmul.mubr.msk.f32.gmra.mrb[2].mxu0 %vm543_vm1, %v495_v11  ;;  %p1886_p2 = por %p1885_p1, %p1884_p0 }
  0x22   : > { %648 = vmatprep.mubr.f32.mxu0 %v1941_v0  ;;  %714 = vperm.xlu0 %1871, %v701_v15   ;;  %p1880_p13 = pneg %p1879_p12 }
  0x23   : > { %719 = vperm.xlu1 %1872, %v702_v16  }
  0x24   : > { %p1887_p3 = pnand %p1886_p2, %p1880_p13 }
  0x25   : > { %1708 = vmatmul.mubr.msk.f32.gmra.mrb[4].mxu0 %vm543_vm1, %v496_v14 }
  0x26   : > { %654 = vmatprep.mubr.f32.mxu0 %v1941_v0  ;;  %724 = vperm.xlu0 %1871, %v703_v18  }
  0x27   : > { %729 = vperm.xlu1 %1872, %v704_v19  }
  0x29   : > { %1709 = vmatmul.mubr.msk.f32.gmra.mrb[6].mxu0 %vm543_vm1, %v497_v17 }
  0x2a   : > { %660 = vmatprep.mubr.f32.mxu0 %v1941_v0  ;;  %734 = vperm.xlu0 %1871, %v705_v21  }
  0x2b   : > { %739 = vperm.xlu1 %1872, %v706_v22  }
  0x2d   : > { %1710 = vmatmul.mubr.msk.f32.gmra.mrb[8].mxu0 %vm543_vm1, %v498_v20 }
  0x2e   : > { %666 = vmatprep.mubr.f32.mxu0 %v1941_v0  ;;  %896 = vperm.xlu0 %1871, %v893_v24  }
  0x2f   : > { %1244 = vperm.xlu1 %1872, %v1235_v25  }
  0x31   : > { %1711 = vmatmul.mubr.msk.f32.gmra.mrb[10].mxu0 %vm543_vm1, %v499_v23 }
  0x32   : > { %672 = vmatprep.mubr.f32.mxu0 %v1941_v0  ;;  %1249 = vperm.xlu0 %1871, %v1236_v27  }
  0x33   : > { %1254 = vperm.xlu1 %1872, %v1237_v28  }
  0x35   : > { %1712 = vmatmul.mubr.msk.f32.gmra.mrb[12].mxu0 %vm543_vm1, %v500_v26 }
  0x36   : > { %972 = vmatprep.mubr.f32.mxu0 %v1941_v0  ;;  %1259 = vperm.xlu0 %1871, %v1238_v29  }
  0x37   : > { %1264 = vperm.xlu1 %1872, %v1239_v30  }
  0x3a   : > { %1269 = vperm.xlu0 %1871, %v1240_v31  }
  0x3b   : > { %1274 = vperm.xlu1 %1872, %v1241_v32  }
  0x3e   : > { %1455 = vperm.xlu0 %1871, %v1446_v33   ;;  %v693_v33 = vld [vmem:[%s2445_s4] sm:$0xff] }
  0x3f   : > { %1460 = vperm.xlu1 %1872, %v1447_v34   ;;  %v694_v34 = vld [vmem:[%s2445_s4 + $0x8] sm:$0xff] }
  0x42   : > { %1465 = vperm.xlu0 %1871, %v1448_v35   ;;  %v695_v35 = vld [vmem:[%s2445_s4 + $0x10] sm:$0xff] }
  0x43   : > { %1470 = vperm.xlu1 %1872, %v1449_v36   ;;  %v696_v36 = vld [vmem:[%s2445_s4 + $0x18] sm:$0xff] }
  0x46   : > { %1475 = vperm.xlu0 %1871, %v1450_v37   ;;  %v697_v37 = vld [vmem:[%s2445_s4 + $0x20] sm:$0xff] }
  0x47   : > { %1480 = vperm.xlu1 %1872, %v1451_v38   ;;  %v698_v38 = vld [vmem:[%s2445_s4 + $0x28] sm:$0xff] }
  0x4a   : > { %1485 = vperm.xlu0 %1871, %v1452_v39   ;;  %v699_v39 = vld [vmem:[%s2445_s4 + $0x30] sm:$0x3] }
  0x4b   : > { %1600 = vperm.xlu1 %1872, %v1597_v40  }
  0x91   : > { %v511_v41 = vpop.permute.xlu0 %510  ;;  %v521_v50 = vpop.permute.xlu1 %520 }
  0x95   : > { %v516_v45 = vpop.permute.xlu0 %515  ;;  %v526_v61 = vpop.permute.xlu1 %525 }
  0x99   : > { %v531_v11 = vpop.permute.xlu0 %530  ;;  %v536_v14 = vpop.permute.xlu1 %535 }
  0x9d   : > { %v541_v25 = vpop.permute.xlu0 %540 }
  0xf0   : > { %v638_v42 = vpop.f32.mrb[0].mxu0 }
  0xf1   : > { %v640_v43 = vpop.f32.mrb[1].mxu0  ;;  %v639_v44 = vadd.f32 %v638_v42, %v511_v41  ;;  %v710_v42 = vpop.permute.xlu1 %709 }
  0xf2   : > { %v641_v46 = vadd.f32 %v640_v43, %v511_v41 }
  0xf3   : > { %v679_v52 = vmax.f32 %v639_v44, 0.0  ;;  %v715_v44 = vpop.permute.xlu0 %714 }
  0xf4   : > { %v644_v47 = vpop.f32.mrb[2].mxu0  ;;  %v680_v54 = vmax.f32 %v641_v46, 0.0 }
  0xf5   : > { %v645_v48 = vadd.f32 %v644_v47, %v516_v45  ;;  %v646_v49 = vpop.f32.mrb[3].mxu0 }
  0xf6   : > { %v647_v51 = vadd.f32 %v646_v49, %v516_v45 }
  0xf7   : > { %v681_v53 = vmax.f32 %v645_v48, 0.0 }
  0xf8   : > { %v682_v55 = vmax.f32 %v647_v51, 0.0  ;;  %v650_v56 = vpop.f32.mrb[4].mxu0 }
  0xf9   : > { %v652_v57 = vpop.f32.mrb[5].mxu0  ;;  %v1762_v58 = vpack.c.bf16 %v681_v53, %v679_v52  ;;  %v651_v60 = vadd.f32 %v650_v56, %v521_v50 }
  0xfa   : > { %v1760_v59 = vpack.c.bf16 %v682_v55, %v680_v54  ;;  %v653_v62 = vadd.f32 %v652_v57, %v521_v50  ;;  %v720_v57 = vpop.permute.xlu1 %719 }
  0xfb   : > { %v683_v4 = vmax.f32 %v651_v60, 0.0  ;;  %v725_v60 = vpop.permute.xlu0 %724 }
  0xfc   : > { %v656_v63 = vpop.f32.mrb[6].mxu0  ;;  %1761 = vmatprep.subr.bf16.mxu1 %v1760_v59  ;;  %v684_v6 = vmax.f32 %v653_v62, 0.0 }
  0xfd   : > { %v657_v1 = vadd.f32 %v656_v63, %v526_v61  ;;  %v658_v2 = vpop.f32.mrb[7].mxu0  ;;  %1763 = vmatpush1.bf16.msra.mxu1 %v1762_v58 }
  0xfe   : > { %v659_v3 = vadd.f32 %v658_v2, %v526_v61 }
  0xff   : > { %v685_v5 = vmax.f32 %v657_v1, 0.0 }
 0x100   : > { %v686_v7 = vmax.f32 %v659_v3, 0.0  ;;  %v662_v8 = vpop.f32.mrb[8].mxu0 }
 0x101   : > { %v1766_v9 = vpack.c.bf16 %v685_v5, %v683_v4  ;;  %v664_v10 = vpop.f32.mrb[9].mxu0  ;;  %v663_v13 = vadd.f32 %v662_v8, %v531_v11 }
 0x102   : > { %v1764_v12 = vpack.c.bf16 %v686_v7, %v684_v6  ;;  %v665_v15 = vadd.f32 %v664_v10, %v531_v11  ;;  %v730_v10 = vpop.permute.xlu1 %729 }
 0x103   : > { %v687_v20 = vmax.f32 %v663_v13, 0.0  ;;  %v735_v13 = vpop.permute.xlu0 %734 }
 0x104   : > { %v668_v16 = vpop.f32.mrb[10].mxu0  ;;  %1765 = vmatprep.subr.bf16.mxu1 %v1764_v12  ;;  %v688_v22 = vmax.f32 %v665_v15, 0.0 }
 0x105   : > { %v669_v17 = vadd.f32 %v668_v16, %v536_v14  ;;  %v670_v18 = vpop.f32.mrb[11].mxu0  ;;  %1767 = vmatpush1.bf16.msra.mxu1 %v1766_v9 }
 0x106   : > { %v671_v19 = vadd.f32 %v670_v18, %v536_v14 }
 0x107   : > { %v689_v21 = vmax.f32 %v669_v17, 0.0 }
 0x108   : > { %v690_v23 = vmax.f32 %v671_v19, 0.0  ;;  %v674_v24 = vpop.f32.mrb[12].mxu0 }
 0x109   : > { %v1770_v26 = vpack.c.bf16 %v689_v21, %v687_v20  ;;  %v676_v27 = vpop.f32.mrb[13].mxu0  ;;  %v675_v30 = vadd.f32 %v674_v24, %v541_v25  ;;  %v740_v24 = vpop.permute.xlu1 %739 }
 0x10a   : > { %v1768_v28 = vpack.c.bf16 %v690_v23, %v688_v22  ;;  %v677_v29 = vadd.f32 %v676_v27, %v541_v25 }
 0x10b   : > { %v691_v32 = vmax.f32 %v675_v30, 0.0 }
 0x10c   : > { %v692_v31 = vmax.f32 %v677_v29, 0.0  ;;  %1769 = vmatprep.subr.bf16.mxu1 %v1768_v28 }
 0x10d   : > { %1771 = vmatpush1.bf16.msra.mxu1 %v1770_v26 }
 0x10e   : > { %1713 = vmatprep.subr.msk.mxu1 %vm764_vm2, %v692_v31 }
 0x111   : > { %1714 = vmatpush1.msk.msra.mxu1 %vm764_vm2, %v691_v32  ;;  %v892_v32 = vld [vmem:[%s2447_s6] sm:$0xf] }
 0x112   : > { %1715 = vmatmul.mubr.msk.f32.vlgmr.msra.gmra.mrb[0].mxu1 %vm742_vm3, %v693_v33  ;;  %v897_v33 = vpop.permute.xlu0 %896 }
 0x113   : > { %841 = vmatprep.mubr.f32.mxu1 %v1941_v0 }
 0x116   : > { %1716 = vmatmul.mubr.msk.f32.gmra.mrb[2].mxu1 %vm742_vm3, %v694_v34 }
 0x117   : > { %847 = vmatprep.mubr.f32.mxu1 %v1941_v0 }
 0x11a   : > { %1717 = vmatmul.mubr.msk.f32.gmra.mrb[4].mxu1 %vm742_vm3, %v695_v35 }
 0x11b   : > { %853 = vmatprep.mubr.f32.mxu1 %v1941_v0 }
 0x11e   : > { %1718 = vmatmul.mubr.msk.f32.gmra.mrb[6].mxu1 %vm742_vm3, %v696_v36 }
 0x11f   : > { %859 = vmatprep.mubr.f32.mxu1 %v1941_v0 }
 0x122   : > { %1719 = vmatmul.mubr.msk.f32.gmra.mrb[8].mxu1 %vm742_vm3, %v697_v37 }
 0x123   : > { %865 = vmatprep.mubr.f32.mxu1 %v1941_v0 }
 0x126   : > { %1720 = vmatmul.mubr.msk.f32.gmra.mrb[10].mxu1 %vm742_vm3, %v698_v38 }
 0x127   : > { %871 = vmatprep.mubr.f32.mxu1 %v1941_v0 }
 0x12a   : > { %1721 = vmatmul.mubr.msk.f32.gmra.mrb[12].mxu1 %vm742_vm3, %v699_v39 }
 0x12b   : > { %1168 = vmatprep.mubr.f32.mxu1 %v1941_v0 }
 0x1e5   : > { %v837_v40 = vpop.f32.mrb[0].mxu1 }
 0x1e6   : > { %v839_v41 = vpop.f32.mrb[1].mxu1  ;;  %v838_v43 = vadd.f32 %v837_v40, %v710_v42 }
 0x1e7   : > { %v840_v45 = vadd.f32 %v839_v41, %v710_v42  ;;  %v1943_v42 = vmov 1983009808  }
 0x1e8   : > { %v878_v50 = vmax.f32 %v838_v43, 0.0  ;;  %v991_v43 = vunpack.c.l.s4 %v1943_v42 }
 0x1e9   : > { %v843_v46 = vpop.f32.mrb[2].mxu1  ;;  %v879_v52 = vmax.f32 %v840_v45, 0.0 }
 0x1ea   : > { %v844_v47 = vadd.f32 %v843_v46, %v715_v44  ;;  %v845_v48 = vpop.f32.mrb[3].mxu1  ;;  %v992_v45 = vunpack.c.0.s8 %v991_v43 }
 0x1eb   : > { %v846_v49 = vadd.f32 %v845_v48, %v715_v44  ;;  %v993_v44 = vlaneseq }
 0x1ec   : > { %v880_v51 = vmax.f32 %v844_v47, 0.0 }
 0x1ed   : > { %v881_v53 = vmax.f32 %v846_v49, 0.0  ;;  %v849_v54 = vpop.f32.mrb[4].mxu1  ;;  %v994_v46 = vshrl.u32 %v993_v44, 7 }
 0x1ee   : > { %v1774_v55 = vpack.c.bf16 %v880_v51, %v878_v50  ;;  %v851_v56 = vpop.f32.mrb[5].mxu1  ;;  %v850_v59 = vadd.f32 %v849_v54, %v720_v57 }
 0x1ef   : > { %v1772_v58 = vpack.c.bf16 %v881_v53, %v879_v52  ;;  %v852_v61 = vadd.f32 %v851_v56, %v720_v57  ;;  %v995_v48 = vsub.s32 %v992_v45, %v994_v46  ;;  %v493_v52 = vld [vmem:[%s488_s27] sm:$0xf] }
 0x1f0   : > { %v882_v3 = vmax.f32 %v850_v59, 0.0  ;;  %v1013_v59 = vld [vmem:[%s2449_s8] sm:$0xff] }
 0x1f1   : > { %v855_v62 = vpop.f32.mrb[6].mxu1  ;;  %1773 = vmatprep.subr.bf16.mxu0 %v1772_v58  ;;  %v883_v5 = vmax.f32 %v852_v61, 0.0  ;;  %v1014_v61 = vld [vmem:[%s2449_s8 + $0x8] sm:$0xff] }
 0x1f2   : > { %v856_v63 = vadd.f32 %v855_v62, %v725_v60  ;;  %v857_v1 = vpop.f32.mrb[7].mxu1  ;;  %1775 = vmatpush1.bf16.msra.mxu0 %v1774_v55  ;;  %v1018_v62 = vld [vmem:[%s2449_s8 + $0x28] sm:$0xff] }
 0x1f3   : > { %v858_v2 = vadd.f32 %v857_v1, %v725_v60  ;;  %v1017_v60 = vld [vmem:[%s2449_s8 + $0x20] sm:$0xff]  ;;  %v1019_v1 = vld [vmem:[%s2449_s8 + $0x30] sm:$0xff] }
 0x1f4   : > { %v884_v4 = vmax.f32 %v856_v63, 0.0  ;;  %v1015_v63 = vld [vmem:[%s2449_s8 + $0x10] sm:$0xff] }
 0x1f5   : > { %v885_v6 = vmax.f32 %v858_v2, 0.0  ;;  %v861_v7 = vpop.f32.mrb[8].mxu1  ;;  %v1016_v2 = vld [vmem:[%s2449_s8 + $0x18] sm:$0xff] }
 0x1f6   : > { %v1778_v8 = vpack.c.bf16 %v884_v4, %v882_v3  ;;  %v863_v9 = vpop.f32.mrb[9].mxu1  ;;  %v862_v12 = vadd.f32 %v861_v7, %v730_v10  ;;  %v1020_v3 = vld [vmem:[%s2449_s8 + $0x38] sm:$0xff]  ;;  %v1021_v4 = vld [vmem:[%s2449_s8 + $0x40] sm:$0xff] }
 0x1f7   : > { %v1776_v11 = vpack.c.bf16 %v885_v6, %v883_v5  ;;  %v864_v14 = vadd.f32 %v863_v9, %v730_v10  ;;  %v1022_v5 = vld [vmem:[%s2449_s8 + $0x48] sm:$0xff]  ;;  %v1023_v6 = vld [vmem:[%s2449_s8 + $0x50] sm:$0xff]  ;;  %v1024_v7 = vld [vmem:[%s2449_s8 + $0x58] sm:$0xff]  ;;  %v1245_v10 = vpop.permute.xlu1 %1244 }
 0x1f8   : > { %v886_v19 = vmax.f32 %v862_v12, 0.0  ;;  %v1026_v9 = vld [vmem:[%s2449_s8 + $0x68] sm:$0xff] }
 0x1f9   : > { %v867_v15 = vpop.f32.mrb[10].mxu1  ;;  %1777 = vmatprep.subr.bf16.mxu0 %v1776_v11  ;;  %v887_v21 = vmax.f32 %v864_v14, 0.0  ;;  %v1250_v11 = vpop.permute.xlu0 %1249 }
 0x1fa   : > { %v868_v16 = vadd.f32 %v867_v15, %v735_v13  ;;  %v869_v17 = vpop.f32.mrb[11].mxu1  ;;  %1779 = vmatpush1.bf16.msra.mxu0 %v1778_v8  ;;  %v1025_v8 = vld [vmem:[%s2449_s8 + $0x60] sm:$0xff] }
 0x1fb   : > { %v870_v18 = vadd.f32 %v869_v17, %v735_v13  ;;  %v1255_v12 = vpop.permute.xlu1 %1254 }
 0x1fc   : > { %v888_v20 = vmax.f32 %v868_v16, 0.0 }
 0x1fd   : > { %v889_v22 = vmax.f32 %v870_v18, 0.0  ;;  %v873_v23 = vpop.f32.mrb[12].mxu1  ;;  %v1260_v13 = vpop.permute.xlu0 %1259 }
 0x1fe   : > { %v1782_v25 = vpack.c.bf16 %v888_v20, %v886_v19  ;;  %v875_v26 = vpop.f32.mrb[13].mxu1  ;;  %v874_v29 = vadd.f32 %v873_v23, %v740_v24 }
 0x1ff   : > { %v1780_v27 = vpack.c.bf16 %v889_v22, %v887_v21  ;;  %v876_v28 = vadd.f32 %v875_v26, %v740_v24  ;;  %v1265_v18 = vpop.permute.xlu1 %1264 }
 0x200   : > { %v890_v31 = vmax.f32 %v874_v29, 0.0 }
 0x201   : > { %v891_v30 = vmax.f32 %v876_v28, 0.0  ;;  %1781 = vmatprep.subr.bf16.mxu0 %v1780_v27  ;;  %v1270_v19 = vpop.permute.xlu0 %1269 }
 0x202   : > { %1783 = vmatpush1.bf16.msra.mxu0 %v1782_v25 }
 0x203   : > { %1722 = vmatprep.subr.msk.mxu0 %vm764_vm2, %v891_v30 }
 0x206   : > { %1723 = vmatpush1.msk.msra.mxu0 %vm764_vm2, %v890_v31 }
 0x207   : > { %1724 = vmatmul.mubr.msk.f32.vlgmr.msra.gmra.mrb[14].mxu0 %vm742_vm3, %v892_v32 }
 0x208   : > { %1144 = vmatprep.mubr.f32.mxu0 %v1941_v0 }
 0x2da   : > { %v974_v34 = vpop.f32.mrb[14].mxu0 }
 0x2db   : > { %v975_v35 = vadd.f32 %v974_v34, %v897_v33  ;;  %v976_v36 = vpop.f32.mrb[15].mxu0 }
 0x2dc   : > { %v977_v37 = vadd.f32 %v976_v36, %v897_v33 }
 0x2dd   : > { %979 = vst [vmem:[%s2252_s29] sm:$0xf] %v975_v35  ;;  %v981_v38 = vmul.f32 0.5, %v975_v35 }
 0x2de   : > { %980 = vst [vmem:[%s2252_s29 + $0x8] sm:$0xf] %v977_v37  ;;  %v982_v39 = vmul.f32 0.5, %v977_v37 }
 0x2df   : > { %v983_v40 = vmul.f32 1.442695, %v981_v38 }
 0x2e0   : > { %v985_v41 = vmul.f32 1.442695, %v982_v39 }
 0x2e1   : > { %1873 = vpow2.f32 %v983_v40 }
 0x2e2   : > { %1875 = vpow2.f32 %v985_v41 }
 0x2eb   : > { %v1874_v47 = vpop.eup %1873 }
 0x2ec   : > { %v1876_v49 = vpop.eup %1875 }
 0x2ed   : > { %v989_v50 = vcombine.low %v1874_v47, %v1876_v49 }
 0x2ef   : > { %v996_v51 = vrot.slane %v989_v50, %v995_v48 }
 0x2f1   : > { %v997_v53 = vcombine.high %v996_v51, %v996_v51 }
 0x2f3   : > { %v999_v54 = vmul.f32 %v997_v53, %v493_v52 }
 0x2f5   : > { %v1007_v55 = vrot.slane %v999_v54, %v995_v48 }
 0x2f7   : > { %v1008_v56 = vcombine.high %v1007_v55, %v1007_v55  ;;  %v1011_v57 = vadd.f32 %v1007_v55, %v975_v35 }
 0x2f9   : > { %v1012_v58 = vadd.f32 %v1008_v56, %v977_v37 }
 0x2fb   : > { %1725 = vmatprep.subr.msk.mxu0 %vm764_vm2, %v1012_v58  ;;  %1808 = vmatprep.subr.msk.mxu1 %vm764_vm2, %v1012_v58 }
 0x2fc   : > { %1726 = vmatpush1.msk.msra.mxu0 %vm764_vm2, %v1011_v57  ;;  %1809 = vmatpush1.msk.msra.mxu1 %vm764_vm2, %v1011_v57 }
 0x2fd   : > { %1727 = vmatmul.mubr.msk.f32.vlgmr.msra.gmra.mrb[16].mxu0 %vm1028_vm4, %v1013_v59  ;;  %1731 = vmatmul.mubr.msk.f32.vlgmr.msra.gmra.mrb[14].mxu1 %vm1028_vm4, %v1017_v60  ;;  %v1275_v60 = vpop.permute.xlu1 %1274 }
 0x2fe   : > { %1150 = vmatprep.mubr.f32.mxu0 %v1941_v0  ;;  %1174 = vmatprep.mubr.f32.mxu1 %v1941_v0 }
 0x301   : > { %1728 = vmatmul.mubr.msk.f32.gmra.mrb[18].mxu0 %vm1028_vm4, %v1014_v61  ;;  %1732 = vmatmul.mubr.msk.f32.gmra.mrb[16].mxu1 %vm1028_vm4, %v1018_v62 }
 0x302   : > { %1156 = vmatprep.mubr.f32.mxu0 %v1941_v0  ;;  %1180 = vmatprep.mubr.f32.mxu1 %v1941_v0 }
 0x305   : > { %1729 = vmatmul.mubr.msk.f32.gmra.mrb[20].mxu0 %vm1028_vm4, %v1015_v63  ;;  %1733 = vmatmul.mubr.msk.f32.gmra.mrb[18].mxu1 %vm1028_vm4, %v1019_v1 }
 0x306   : > { %1162 = vmatprep.mubr.f32.mxu0 %v1941_v0  ;;  %1186 = vmatprep.mubr.f32.mxu1 %v1941_v0 }
 0x309   : > { %1730 = vmatmul.mubr.msk.f32.gmra.mrb[22].mxu0 %vm1028_vm4, %v1016_v2  ;;  %1734 = vmatmul.mubr.msk.f32.gmra.mrb[20].mxu1 %vm1028_vm4, %v1020_v3  ;;  %v1305_v2 = vld [vmem:[%s2451_s10] sm:$0xff]  ;;  %v1306_v3 = vld [vmem:[%s2451_s10 + $0x8] sm:$0xff] }
 0x30a   : > { %1403 = vmatprep.mubr.f32.mxu0 %v1941_v0  ;;  %1192 = vmatprep.mubr.f32.mxu1 %v1941_v0 }
 0x30d   : > { %1735 = vmatmul.mubr.msk.f32.gmra.mrb[22].mxu1 %vm1028_vm4, %v1021_v4  ;;  %v1307_v4 = vld [vmem:[%s2451_s10 + $0x10] sm:$0xff] }
 0x30e   : > { %1198 = vmatprep.mubr.f32.mxu1 %v1941_v0 }
 0x311   : > { %1736 = vmatmul.mubr.msk.f32.gmra.mrb[24].mxu1 %vm1028_vm4, %v1022_v5  ;;  %v1308_v5 = vld [vmem:[%s2451_s10 + $0x18] sm:$0xff] }
 0x312   : > { %1204 = vmatprep.mubr.f32.mxu1 %v1941_v0 }
 0x315   : > { %1737 = vmatmul.mubr.msk.f32.gmra.mrb[26].mxu1 %vm1028_vm4, %v1023_v6  ;;  %v1309_v6 = vld [vmem:[%s2451_s10 + $0x20] sm:$0xff] }
 0x316   : > { %1210 = vmatprep.mubr.f32.mxu1 %v1941_v0 }
 0x319   : > { %1738 = vmatmul.mubr.msk.f32.gmra.mrb[28].mxu1 %vm1028_vm4, %v1024_v7  ;;  %v1310_v7 = vld [vmem:[%s2451_s10 + $0x28] sm:$0xff] }
 0x31a   : > { %1216 = vmatprep.mubr.f32.mxu1 %v1941_v0 }
 0x31d   : > { %1739 = vmatmul.mubr.msk.f32.gmra.mrb[30].mxu1 %vm1028_vm4, %v1025_v8  ;;  %v1311_v8 = vld [vmem:[%s2451_s10 + $0x30] sm:$0x3] }
 0x31e   : > { %1222 = vmatprep.mubr.f32.mxu1 %v1941_v0 }
 0x321   : > { %1740 = vmatmul.mubr.msk.f32.gmra.mrb[32].mxu1 %vm1028_vm4, %v1026_v9 }
 0x322   : > { %1228 = vmatprep.mubr.f32.mxu1 %v1941_v0 }
 0x3d0   : > { %v1146_v14 = vpop.f32.mrb[16].mxu0  ;;  %v1170_v15 = vpop.f32.mrb[14].mxu1 }
 0x3d1   : > { %v1148_v16 = vpop.f32.mrb[17].mxu0  ;;  %v1172_v17 = vpop.f32.mrb[15].mxu1  ;;  %v1277_v20 = vadd.f32 %v1245_v10, %v1146_v14  ;;  %v1285_v21 = vadd.f32 %v1265_v18, %v1170_v15 }
 0x3d2   : > { %v1278_v22 = vadd.f32 %v1245_v10, %v1148_v16  ;;  %v1286_v23 = vadd.f32 %v1265_v18, %v1172_v17 }
 0x3d3   : > { %v1291_v32 = vmax.f32 %v1277_v20, 0.0  ;;  %v1299_v33 = vmax.f32 %v1285_v21, 0.0 }
 0x3d4   : > { %v1152_v24 = vpop.f32.mrb[18].mxu0  ;;  %v1176_v25 = vpop.f32.mrb[16].mxu1  ;;  %v1292_v36 = vmax.f32 %v1278_v22, 0.0  ;;  %v1300_v37 = vmax.f32 %v1286_v23, 0.0 }
 0x3d5   : > { %v1279_v26 = vadd.f32 %v1250_v11, %v1152_v24  ;;  %v1287_v27 = vadd.f32 %v1270_v19, %v1176_v25  ;;  %v1154_v28 = vpop.f32.mrb[19].mxu0  ;;  %v1178_v29 = vpop.f32.mrb[17].mxu1 }
 0x3d6   : > { %v1280_v30 = vadd.f32 %v1250_v11, %v1154_v28  ;;  %v1288_v31 = vadd.f32 %v1270_v19, %v1178_v29 }
 0x3d7   : > { %v1293_v34 = vmax.f32 %v1279_v26, 0.0  ;;  %v1301_v35 = vmax.f32 %v1287_v27, 0.0  ;;  %v1456_v27 = vpop.permute.xlu0 %1455 }
 0x3d8   : > { %v1294_v38 = vmax.f32 %v1280_v30, 0.0  ;;  %v1302_v39 = vmax.f32 %v1288_v31, 0.0  ;;  %v1158_v40 = vpop.f32.mrb[20].mxu0  ;;  %v1182_v41 = vpop.f32.mrb[18].mxu1 }
 0x3d9   : > { %v1786_v42 = vpack.c.bf16 %v1293_v34, %v1291_v32  ;;  %v1794_v43 = vpack.c.bf16 %v1301_v35, %v1299_v33  ;;  %v1160_v44 = vpop.f32.mrb[21].mxu0  ;;  %v1184_v45 = vpop.f32.mrb[19].mxu1  ;;  %v1281_v48 = vadd.f32 %v1255_v12, %v1158_v40  ;;  %v1289_v62 = vadd.f32 %v1275_v60, %v1182_v41 }
 0x3da   : > { %v1784_v46 = vpack.c.bf16 %v1294_v38, %v1292_v36  ;;  %v1792_v47 = vpack.c.bf16 %v1302_v39, %v1300_v37  ;;  %v1282_v49 = vadd.f32 %v1255_v12, %v1160_v44  ;;  %v1290_v61 = vadd.f32 %v1275_v60, %v1184_v45  ;;  %v1461_v32 = vpop.permute.xlu1 %1460 }
 0x3db   : > { %v1295_v54 = vmax.f32 %v1281_v48, 0.0  ;;  %v1303_v1 = vmax.f32 %v1289_v62, 0.0 }
 0x3dc   : > { %v1164_v50 = vpop.f32.mrb[22].mxu0  ;;  %1785 = vmatprep.subr.bf16.mxu0 %v1784_v46  ;;  %v1296_v56 = vmax.f32 %v1282_v49, 0.0  ;;  %v1304_v63 = vmax.f32 %v1290_v61, 0.0  ;;  %v1188_v9 = vpop.f32.mrb[20].mxu1 }
 0x3dd   : > { %v1283_v51 = vadd.f32 %v1260_v13, %v1164_v50  ;;  %v1166_v52 = vpop.f32.mrb[23].mxu0  ;;  %1787 = vmatpush1.bf16.msra.mxu0 %v1786_v42  ;;  %v1190_v10 = vpop.f32.mrb[21].mxu1 }
 0x3de   : > { %v1284_v53 = vadd.f32 %v1260_v13, %v1166_v52  ;;  %v1466_v46 = vpop.permute.xlu0 %1465  ;;  %v1471_v52 = vpop.permute.xlu1 %1470 }
 0x3df   : > { %v1297_v55 = vmax.f32 %v1283_v51, 0.0 }
 0x3e0   : > { %v1298_v57 = vmax.f32 %v1284_v53, 0.0  ;;  %v1194_v11 = vpop.f32.mrb[22].mxu1 }
 0x3e1   : > { %v1790_v58 = vpack.c.bf16 %v1297_v55, %v1295_v54  ;;  %v1196_v12 = vpop.f32.mrb[23].mxu1 }
 0x3e2   : > { %v1788_v59 = vpack.c.bf16 %v1298_v57, %v1296_v56 }
 0x3e4   : > { %1789 = vmatprep.subr.bf16.mxu0 %v1788_v59  ;;  %v1200_v13 = vpop.f32.mrb[24].mxu1 }
 0x3e5   : > { %1791 = vmatpush1.bf16.msra.mxu0 %v1790_v58  ;;  %v1202_v14 = vpop.f32.mrb[25].mxu1 }
 0x3e6   : > { %1793 = vmatprep.subr.bf16.mxu0 %v1792_v47 }
 0x3e8   : > { %v1206_v15 = vpop.f32.mrb[26].mxu1 }
 0x3e9   : > { %1795 = vmatpush1.bf16.msra.mxu0 %v1794_v43  ;;  %v1208_v16 = vpop.f32.mrb[27].mxu1 }
 0x3ea   : > { %1742 = vmatprep.subr.msk.mxu0 %vm764_vm2, %v1304_v63 }
 0x3ec   : > { %v1212_v17 = vpop.f32.mrb[28].mxu1 }
 0x3ed   : > { %1743 = vmatpush1.msk.msra.mxu0 %vm764_vm2, %v1303_v1  ;;  %v1214_v18 = vpop.f32.mrb[29].mxu1 }
 0x3ee   : > { %1744 = vmatmul.mubr.msk.f32.vlgmr.msra.gmra.mrb[24].mxu0 %vm742_vm3, %v1305_v2 }
 0x3ef   : > { %1409 = vmatprep.mubr.f32.mxu0 %v1941_v0 }
 0x3f0   : > { %v1218_v19 = vpop.f32.mrb[30].mxu1 }
 0x3f1   : > { %v1220_v20 = vpop.f32.mrb[31].mxu1 }
 0x3f2   : > { %1745 = vmatmul.mubr.msk.f32.gmra.mrb[26].mxu0 %vm742_vm3, %v1306_v3  ;;  %v1476_v3 = vpop.permute.xlu0 %1475 }
 0x3f3   : > { %1415 = vmatprep.mubr.f32.mxu0 %v1941_v0 }
 0x3f4   : > { %v2371_v21 = vpop.f32.mrb[32].mxu1 }
 0x3f5   : > { %v2373_v22 = vpop.f32.mrb[33].mxu1 }
 0x3f6   : > { %1746 = vmatmul.mubr.msk.f32.gmra.mrb[28].mxu0 %vm742_vm3, %v1307_v4 }
 0x3f7   : > { %1421 = vmatprep.mubr.f32.mxu0 %v1941_v0 }
 0x3fa   : > { %1747 = vmatmul.mubr.msk.f32.gmra.mrb[30].mxu0 %vm742_vm3, %v1308_v5 }
 0x3fb   : > { %1427 = vmatprep.mubr.f32.mxu0 %v1941_v0 }
 0x3fe   : > { %1748 = vmatmul.mubr.msk.f32.gmra.mrb[32].mxu0 %vm742_vm3, %v1309_v6 }
 0x3ff   : > { %1433 = vmatprep.mubr.f32.mxu0 %v1941_v0 }
 0x402   : > { %1749 = vmatmul.mubr.msk.f32.gmra.mrb[34].mxu0 %vm742_vm3, %v1310_v7 }
 0x403   : > { %1439 = vmatprep.mubr.f32.mxu0 %v1941_v0 }
 0x406   : > { %1750 = vmatmul.mubr.msk.f32.gmra.mrb[36].mxu0 %vm742_vm3, %v1311_v8 }
 0x407   : > { %1590 = vmatprep.mubr.f32.mxu0 %v1941_v0  ;;  %v1027_v0 = vld [vmem:[%s2449_s8 + $0x70] sm:$0xff] }
 0x408   : > { %1741 = vmatmul.mubr.msk.f32.gmra.mrb[34].mxu1 %vm1028_vm4, %v1027_v0 }
 0x4c1   : > { %v1405_v23 = vpop.f32.mrb[24].mxu0 }
 0x4c2   : > { %v1406_v24 = vadd.f32 %v1405_v23, %v1188_v9  ;;  %v1407_v25 = vpop.f32.mrb[25].mxu0  ;;  %v1481_v9 = vpop.permute.xlu1 %1480 }
 0x4c3   : > { %v1408_v26 = vadd.f32 %v1407_v25, %v1190_v10 }
 0x4c4   : > { %v1488_v29 = vadd.f32 %v1456_v27, %v1406_v24 }
 0x4c5   : > { %v1411_v28 = vpop.f32.mrb[26].mxu0  ;;  %v1489_v33 = vadd.f32 %v1456_v27, %v1408_v26 }
 0x4c6   : > { %v1412_v30 = vadd.f32 %v1411_v28, %v1194_v11  ;;  %v1413_v31 = vpop.f32.mrb[27].mxu0  ;;  %v1502_v38 = vmax.f32 %v1488_v29, 0.0 }
 0x4c7   : > { %v1414_v34 = vadd.f32 %v1413_v31, %v1196_v12  ;;  %v1503_v42 = vmax.f32 %v1489_v33, 0.0 }
 0x4c8   : > { %v1490_v35 = vadd.f32 %v1461_v32, %v1412_v30 }
 0x4c9   : > { %v1491_v36 = vadd.f32 %v1461_v32, %v1414_v34  ;;  %v1417_v37 = vpop.f32.mrb[28].mxu0  ;;  %v1601_v34 = vpop.permute.xlu1 %1600 }
 0x4ca   : > { %v1504_v39 = vmax.f32 %v1490_v35, 0.0  ;;  %v1418_v40 = vadd.f32 %v1417_v37, %v1200_v13  ;;  %v1419_v41 = vpop.f32.mrb[29].mxu0 }
 0x4cb   : > { %v1505_v43 = vmax.f32 %v1491_v36, 0.0  ;;  %v1420_v44 = vadd.f32 %v1419_v41, %v1202_v14 }
 0x4cc   : > { %v1798_v45 = vpack.c.bf16 %v1504_v39, %v1502_v38  ;;  %v1492_v49 = vadd.f32 %v1466_v46, %v1418_v40 }
 0x4cd   : > { %v1423_v47 = vpop.f32.mrb[30].mxu0  ;;  %v1796_v48 = vpack.c.bf16 %v1505_v43, %v1503_v42  ;;  %v1493_v53 = vadd.f32 %v1466_v46, %v1420_v44 }
 0x4ce   : > { %v1424_v50 = vadd.f32 %v1423_v47, %v1206_v15  ;;  %v1425_v51 = vpop.f32.mrb[31].mxu0  ;;  %v1506_v58 = vmax.f32 %v1492_v49, 0.0 }
 0x4cf   : > { %v1426_v54 = vadd.f32 %v1425_v51, %v1208_v16  ;;  %1797 = vmatprep.subr.bf16.mxu0 %v1796_v48  ;;  %v1507_v62 = vmax.f32 %v1493_v53, 0.0 }
 0x4d0   : > { %v1494_v55 = vadd.f32 %v1471_v52, %v1424_v50  ;;  %1799 = vmatpush1.bf16.msra.mxu0 %v1798_v45 }
 0x4d1   : > { %v1495_v56 = vadd.f32 %v1471_v52, %v1426_v54  ;;  %v1429_v57 = vpop.f32.mrb[32].mxu0 }
 0x4d2   : > { %v1508_v59 = vmax.f32 %v1494_v55, 0.0  ;;  %v1430_v60 = vadd.f32 %v1429_v57, %v1212_v17  ;;  %v1431_v61 = vpop.f32.mrb[33].mxu0 }
 0x4d3   : > { %v1509_v63 = vmax.f32 %v1495_v56, 0.0  ;;  %v1432_v1 = vadd.f32 %v1431_v61, %v1214_v18 }
 0x4d4   : > { %v1802_v2 = vpack.c.bf16 %v1508_v59, %v1506_v58  ;;  %v1496_v6 = vadd.f32 %v1476_v3, %v1430_v60 }
 0x4d5   : > { %v1435_v4 = vpop.f32.mrb[34].mxu0  ;;  %v1800_v5 = vpack.c.bf16 %v1509_v63, %v1507_v62  ;;  %v1497_v10 = vadd.f32 %v1476_v3, %v1432_v1 }
 0x4d6   : > { %v1436_v7 = vadd.f32 %v1435_v4, %v1218_v19  ;;  %v1437_v8 = vpop.f32.mrb[35].mxu0  ;;  %v1510_v15 = vmax.f32 %v1496_v6, 0.0  ;;  %v1486_v19 = vpop.permute.xlu0 %1485 }
 0x4d7   : > { %v1438_v11 = vadd.f32 %v1437_v8, %v1220_v20  ;;  %1801 = vmatprep.subr.bf16.mxu0 %v1800_v5  ;;  %v1511_v0 = vmax.f32 %v1497_v10, 0.0 }
 0x4d8   : > { %v1498_v12 = vadd.f32 %v1481_v9, %v1436_v7  ;;  %1803 = vmatpush1.bf16.msra.mxu0 %v1802_v2 }
 0x4d9   : > { %v1499_v13 = vadd.f32 %v1481_v9, %v1438_v11  ;;  %v1441_v14 = vpop.f32.mrb[36].mxu0 }
 0x4da   : > { %v1512_v16 = vmax.f32 %v1498_v12, 0.0  ;;  %v1442_v17 = vadd.f32 %v1441_v14, %v2371_v21  ;;  %v1443_v18 = vpop.f32.mrb[37].mxu0  ;;  %v1516_v21 = vld [vmem:[%s2453_s12] sm:$0x3f] }
 0x4db   : > { %v1513_v23 = vmax.f32 %v1499_v13, 0.0  ;;  %v1444_v24 = vadd.f32 %v1443_v18, %v2373_v22  ;;  %v1230_v22 = vpop.f32.mrb[34].mxu1 }
 0x4dc   : > { %v1806_v25 = vpack.c.bf16 %v1512_v16, %v1510_v15  ;;  %v1500_v27 = vadd.f32 %v1486_v19, %v1442_v17  ;;  %v1232_v30 = vpop.f32.mrb[35].mxu1 }
 0x4dd   : > { %v1501_v26 = vadd.f32 %v1486_v19, %v1444_v24  ;;  %v1804_v20 = vpack.c.bf16 %v1513_v23, %v1511_v0 }
 0x4de   : > { %v1514_v29 = vmax.f32 %v1500_v27, 0.0 }
 0x4df   : > { %v1515_v28 = vmax.f32 %v1501_v26, 0.0  ;;  %1805 = vmatprep.subr.bf16.mxu0 %v1804_v20 }
 0x4e0   : > { %1807 = vmatpush1.bf16.msra.mxu0 %v1806_v25 }
 0x4e1   : > { %1751 = vmatprep.subr.msk.mxu0 %vm764_vm2, %v1515_v28 }
 0x4e4   : > { %1752 = vmatpush1.msk.msra.mxu0 %vm764_vm2, %v1514_v29 }
 0x4e5   : > { %1753 = vmatmul.mubr.msk.f32.vlgmr.msra.gmra.mrb[38].mxu0 %vm742_vm3, %v1516_v21 }
 0x5b8   : > { %v1592_v31 = vpop.f32.mrb[38].mxu0 }
 0x5b9   : > { %v1593_v32 = vadd.f32 %v1592_v31, %v1230_v22  ;;  %v1594_v33 = vpop.f32.mrb[39].mxu0 }
 0x5ba   : > { %v1595_v35 = vadd.f32 %v1594_v33, %v1232_v30 }
 0x5bb   : > { %v1603_v36 = vadd.f32 %v1601_v34, %v1593_v32 }
 0x5bc   : > { %v1604_v37 = vadd.f32 %v1601_v34, %v1595_v35 }
 0x5bd   : > { %1605 = vst [vmem:[%s2252_s29 + $0x10] sm:$0x3f] %v1603_v36 }
 0x5be   : > { %1606 = vst [vmem:[%s2252_s29 + $0x18] sm:$0x3f] %v1604_v37 }
 0x5bf   : > { %1890 = shalt.err (!%p1887_p3)
}
 0x5c0   : > { %s1891_s19 = scalar_lea.hbm %s2394_s28, 512  ;;  %s1895_s21 = scalar_lea.hbm %s2455_s14, 2048 }
 0x5c1   : > { %p1892_p4 = scmp.ne.s32.totalorder %s2394_s28, %s1891_s19  ;;  %p1896_p9 = scmp.lt.u32.totalorder %s2394_s28, %s2455_s14 }
 0x5c2   : > { %p1897_p10 = scmp.lt.u32.totalorder %s1895_s21, %s1891_s19  ;;  %p1899_p12 = scmp.lt.u32.totalorder %s1891_s19, %s2394_s28 }
 0x5c3   : > { %p1893_p7 = pnand %p1892_p4, %p2061_p5 }
 0x5c4   : > { %p1898_p11 = por %p1897_p10, %p1896_p9 }
 0x5c5   : > { %p1894_p8 = pneg %p1893_p7 }
 0x5c6   : > { %p1900_p13 = por %p1899_p12, %p1898_p11 }
 0x5c8   : > { %p1901_p0 = pnand %p1900_p13, %p1894_p8 }
 0x5ca   : > { %1904 = shalt.err (!%p1901_p0)
}
 0x5cb   : > { %s1945_s18 = smov 256   ;;  %s1946_s25 = smov 1024  }
 0x5cc   : > { %s1947_s20 = smov 16  }
 0x5cd   : > { %1826 = dma.vmem_to_hbm [thread:$0]  (%p2061_p5), %s2389_s24, 512, %s2394_s28, %s2400_s17, %s1945_s18, %s1946_s25, %s1947_s20  }
 0x5ce PF: > { %s2468_s15 = sld [smem:[#allocation5_spill]]  ;;  %p1832_p1 = scmp.ge.s32.totalorder %s1939_s16, 2 }
 0x5d0   : > { %p1829_p2 = pnand %p1832_p1, %p2065_p6 }
 0x5d4   : > { %s1636_s22 = sand.u32 1, %s2468_s15  }
 0x5d5   : > { %s1637_s19 = scalar_lea.sflag [#allocation3], %s1636_s22 }
 0x5d6   : > { %1922 = dma.done.wait (!%p1829_p2), %s1637_s19, 512  }
 0x5d7   : > { %1924 = vsyncadd (!%p1829_p2), %s1637_s19, 4294966784  ;;  %s2470_s16 = sld [smem:[#allocation7_spill]]  ;;  %s2471_s21 = sld [smem:[#allocation6_spill]] }
 0x5d8   : > { %s2472_s15 = sld [smem:[#allocation8_spill]]  ;;  %s2473_s29 = smov %s1931_s30 }
 0x5dd   : > { %p24_p3 = scmp.ge.s32.totalorder %s2470_s16, 6   ;;  %s2474_s30 = smov %s2471_s21 }
 0x5df   :  { %26 = sbr.rel (!%p24_p3) target bundleno = 3 (0x3), region = 114 }
 0x5e6   :  { %1642 = vsyncpa [#allocation3], 1 }
 0x5e7   :  { %1644 = vsyncpa [#allocation3 + $0x1], 1 }

</bundles_post_ra>
